<compile_context>
chip_gen: v7x
topology: tpu7x:2x2x1
jax: 0.10.0
libtpu: 0.0.40
codegen_flags: <defaults>
</compile_context>

<pallas_src>
import jax
import jax.numpy as jnp
from jax.experimental import pallas as pl
from jax.experimental.pallas import tpu as pltpu


def _round_up(x, m):
    return (x + m - 1) // m * m


def _pick_chunk(S, max_chunk=16):
    # largest divisor of S that is <= max_chunk (timesteps per grid step)
    for c in range(min(S, max_chunk), 0, -1):
        if S % c == 0:
            return c
    return 1


# ---------------------------------------------------------------------------
# GRU recurrence kernel.
#   Grid = (S // Tc,)  -- one grid step per chunk of Tc timesteps, sequential.
#   Gate order follows PyTorch: r, z, n  (reset, update, new):
#     r_t = sigmoid(xp_r + h W_hr)            (biases b_ir + b_hr folded into xp_r)
#     z_t = sigmoid(xp_z + h W_hz)            (biases b_iz + b_hz folded into xp_z)
#     n_t = tanh  (xp_n + r_t * (h W_hn + b_hn))   (xp_n carries b_in)
#     h_t = (1 - z_t) * n_t + z_t * h_{t-1}
# ---------------------------------------------------------------------------
def gru_kernel(xp_ref, whh_ref, bhn_ref, out_ref, hn_ref):
    """
    xp_ref : (Tc, Bp, 3*Hp) f32   precomputed x @ W_ih_fused + folded biases
    whh_ref: (Hp, 3*Hp)     bf16  fused hidden->gates weight (loop-invariant)
    bhn_ref: (1, Hp)        f32   b_hn (kept separate: multiplied by r)
    out_ref: (Tc, Bp, Hp)   f32   per-step hidden outputs
    hn_ref : (Bp, Hp)       f32   VMEM-resident hidden-state carry == final h_n
    """
    c = pl.program_id(0)

    @pl.when(c == 0)
    def _():
        hn_ref[...] = jnp.zeros_like(hn_ref)      # default hidden=None -> zeros

    Tc = out_ref.shape[0]
    Bp = out_ref.shape[1]
    Hp = out_ref.shape[2]

    # Hoist loop-invariant loads / broadcasts out of the unrolled loop
    # (JAX does not CSE broadcast_in_dim inside loops).
    w = whh_ref[...]                                    # (Hp, 3Hp) bf16
    b_hn = jnp.broadcast_to(bhn_ref[...], (Bp, Hp))     # (Bp, Hp)  f32
    h0 = hn_ref[...]                                    # (Bp, Hp)  f32

    def step(i, h):
        # single fused hidden-side matmul: bf16 operands, f32 accumulation (MXU)
        hp = jnp.dot(h.astype(jnp.bfloat16), w,
                     preferred_element_type=jnp.float32)          # (Bp, 3Hp)
        xp = xp_ref[i]                                            # (Bp, 3Hp)
        r = jax.nn.sigmoid(xp[:, 0 * Hp:1 * Hp] + hp[:, 0 * Hp:1 * Hp])
        z = jax.nn.sigmoid(xp[:, 1 * Hp:2 * Hp] + hp[:, 1 * Hp:2 * Hp])
        n = jnp.tanh(xp[:, 2 * Hp:3 * Hp] + r * (hp[:, 2 * Hp:3 * Hp] + b_hn))
        h_new = (1.0 - z) * n + z * h
        out_ref[i] = h_new.astype(out_ref.dtype)
        return h_new

    h_last = jax.lax.fori_loop(0, Tc, step, h0, unroll=True)
    hn_ref[...] = h_last


def gru_forward(x_proj, w_hh_f, b_hn, *, chunk=None):
    """x_proj: (S, Bp, 3*Hp) f32, w_hh_f: (Hp, 3*Hp) bf16, b_hn: (1, Hp) f32."""
    S, Bp, threeHp = x_proj.shape
    Hp = threeHp // 3
    Tc = _pick_chunk(S) if chunk is None else chunk

    out, h_n = pl.pallas_call(
        gru_kernel,
        out_shape=(
            jax.ShapeDtypeStruct((S, Bp, Hp), jnp.float32),   # GRU output sequence
            jax.ShapeDtypeStruct((Bp, Hp), jnp.float32),      # final hidden state
        ),
        grid_spec=pltpu.PrefetchScalarGridSpec(
            num_scalar_prefetch=0,
            grid=(S // Tc,),
            in_specs=[
                pl.BlockSpec((Tc, Bp, threeHp), lambda c: (c, 0, 0)),   # x-proj chunk
                pl.BlockSpec((Hp, threeHp), lambda c: (0, 0)),          # W_hh fused
                pl.BlockSpec((1, Hp), lambda c: (0, 0)),                # b_hn
            ],
            out_specs=[
                pl.BlockSpec((Tc, Bp, Hp), lambda c: (c, 0, 0)),        # outputs chunk
                pl.BlockSpec((Bp, Hp), lambda c: (0, 0)),               # resident h_n
            ],
        ),
        # Recurrence -> strictly sequential grid.  For very large hidden sizes on
        # v7x (64 MiB VMEM) raise vmem_limit_bytes or keep weights bf16 (done here).
        compiler_params=pltpu.CompilerParams(
            dimension_semantics=("arbitrary",)),
    )(x_proj, w_hh_f, b_hn)
    return out, h_n


class EncoderPallas:
    """JAX/Pallas equivalent of the PyTorch Encoder (Embedding + 1-layer GRU)."""

    def __init__(self, vocab_size, emb_dim=128, rnn_hidden_dim=256, key=None):
        if key is None:
            key = jax.random.PRNGKey(0)
        k_emb, k_wih, k_whh, k_bih, k_bhh = jax.random.split(key, 5)
        E, H = emb_dim, rnn_hidden_dim
        bound = 1.0 / jnp.sqrt(H)
        self.E, self.H = E, H
        self.Hp = _round_up(H, 128)          # lane-dense gate width
        Hp = self.Hp

        # PyTorch-equivalent parameters (gate order r, z, n), stored in f32.
        self.emb = jax.random.normal(k_emb, (vocab_size, E), jnp.float32)
        self.w_ih = jax.random.uniform(k_wih, (3, E, H), jnp.float32, -bound, bound)
        self.w_hh = jax.random.uniform(k_whh, (3, H, H), jnp.float32, -bound, bound)
        self.b_ih = jax.random.uniform(k_bih, (3, H), jnp.float32, -bound, bound)
        self.b_hh = jax.random.uniform(k_bhh, (3, H), jnp.float32, -bound, bound)

        # Fused, lane-padded layouts consumed by the kernel (built once).
        w_ih_f = jnp.zeros((E, 3 * Hp), jnp.float32)
        w_hh_f = jnp.zeros((H, 3 * Hp), jnp.float32)
        b_x = jnp.zeros((3 * Hp,), jnp.float32)
        b_hn = jnp.zeros((1, Hp), jnp.float32)
        for g in range(3):
            w_ih_f = w_ih_f.at[:, g * Hp:g * Hp + H].set(self.w_ih[g])
            w_hh_f = w_hh_f.at[:, g * Hp:g * Hp + H].set(self.w_hh[g])
        # Fold b_hr / b_hz into the x-side bias (r and z gates are purely additive);
        # only b_hn must stay on the hidden side (it is multiplied by r).
        b_x = b_x.at[0 * Hp:0 * Hp + H].set(self.b_ih[0] + self.b_hh[0])
        b_x = b_x.at[1 * Hp:1 * Hp + H].set(self.b_ih[1] + self.b_hh[1])
        b_x = b_x.at[2 * Hp:2 * Hp + H].set(self.b_ih[2])
        b_hn = b_hn.at[0, :H].set(self.b_hh[2])

        self.w_ih_f = w_ih_f.astype(jnp.bfloat16)                       # (E, 3Hp)
        self.w_hh_f = (jnp.zeros((Hp, 3 * Hp), jnp.bfloat16)
                       .at[:H].set(w_hh_f.astype(jnp.bfloat16)))        # (Hp, 3Hp)
        self.b_x = b_x                                                  # (3Hp,)
        self.b_hn = b_hn                                                # (1, Hp)

    def __call__(self, inputs):
        # inputs: (S, B) int32 token ids
        S, B = inputs.shape
        E, H, Hp = self.E, self.H, self.Hp
        Bp = _round_up(B, 8)

        # Embedding lookup (gather) as plain-JAX glue.
        # TODO(synk): the row-gather itself stays outside the Pallas kernel.
        x_emb = jnp.take(self.emb, inputs, axis=0)                      # (S, B, E)

        # Hoisted input projection: one large MXU matmul over all S*B rows,
        # bf16 operands, f32 accumulation, biases pre-folded.
        x_proj = jnp.dot(x_emb.reshape(S * B, E).astype(jnp.bfloat16),
                         self.w_ih_f,
                         preferred_element_type=jnp.float32) + self.b_x
        x_proj = x_proj.reshape(S, B, 3 * Hp)
        if Bp != B:
            x_proj = jnp.pad(x_proj, ((0, 0), (0, Bp - B), (0, 0)))

        out_p, hn_p = gru_forward(x_proj, self.w_hh_f, self.b_hn)
        out = out_p[:, :B, :H]                                          # (S, B, H)
        h_n = hn_p[:B, :H][None]                                        # (1, B, H)
        return out, h_n


# ---------------------------------------------------------------------------
# Pure-JAX reference GRU (per-gate, unfused, unpadded layout) for correctness.
#   matmul_dtype=bf16 mirrors the kernel's numerics (bf16 operands, f32 acc)
#   while exercising an independent weight layout, so it catches fusion bugs.
# ---------------------------------------------------------------------------
def gru_reference(x_emb, w_ih, w_hh, b_ih, b_hh, matmul_dtype=jnp.float32):
    B = x_emb.shape[1]
    H = w_hh.shape[-1]
    xe = x_emb.astype(matmul_dtype)
    wi = w_ih.astype(matmul_dtype)
    wh = w_hh.astype(matmul_dtype)

    def step(h, x):
        hb = h.astype(matmul_dtype)
        i_r = jnp.dot(x, wi[0], preferred_element_type=jnp.float32) + b_ih[0]
        i_z = jnp.dot(x, wi[1], preferred_element_type=jnp.float32) + b_ih[1]
        i_n = jnp.dot(x, wi[2], preferred_element_type=jnp.float32) + b_ih[2]
        h_r = jnp.dot(hb, wh[0], preferred_element_type=jnp.float32) + b_hh[0]
        h_z = jnp.dot(hb, wh[1], preferred_element_type=jnp.float32) + b_hh[1]
        h_n = jnp.dot(hb, wh[2], preferred_element_type=jnp.float32) + b_hh[2]
        r = jax.nn.sigmoid(i_r + h_r)
        z = jax.nn.sigmoid(i_z + h_z)
        n = jnp.tanh(i_n + r * h_n)
        h_new = (1.0 - z) * n + z * h
        return h_new, h_new

    h0 = jnp.zeros((B, H), jnp.float32)
    h_last, outs = jax.lax.scan(step, h0, xe)
    return outs, h_last


if __name__ == "__main__":
    # small shapes consistent with the module's forward
    VOCAB, EMB, HIDDEN = 50, 32, 32
    SEQ, BATCH = 8, 8

    enc = EncoderPallas(VOCAB, emb_dim=EMB, rnn_hidden_dim=HIDDEN,
                        key=jax.random.PRNGKey(0))

    inputs = jax.random.randint(jax.random.PRNGKey(1), (SEQ, BATCH), 0, VOCAB,
                                dtype=jnp.int32)

    out, h_n = enc(inputs)
    out = jax.block_until_ready(out)
    h_n = jax.block_until_ready(h_n)

    assert out.shape == (SEQ, BATCH, HIDDEN)
    assert h_n.shape == (1, BATCH, HIDDEN)

    x_emb = jnp.take(enc.emb, inputs, axis=0)

    # Primary check: reference with the same bf16-operand / f32-accumulate numerics
    # but an independent (unfused, unpadded, per-gate) layout.
    ref_out, ref_h = gru_reference(x_emb, enc.w_ih, enc.w_hh, enc.b_ih, enc.b_hh,
                                   matmul_dtype=jnp.bfloat16)
    assert jnp.allclose(out, ref_out, atol=1e-3, rtol=1e-3), \
        float(jnp.max(jnp.abs(out - ref_out)))
    assert jnp.allclose(h_n[0], ref_h, atol=1e-3, rtol=1e-3)

    # Sanity check: bf16-operand path stays close to the pure f32 GRU math
    # (tolerance widened per bf16 cast, as noted in the review).
    ref_out32, ref_h32 = gru_reference(x_emb, enc.w_ih, enc.w_hh, enc.b_ih, enc.b_hh)
    assert jnp.allclose(out, ref_out32, atol=1e-1, rtol=1e-1)
    assert jnp.allclose(h_n[0], ref_h32, atol=1e-1, rtol=1e-1)

    print("KERNEL_OK")
</pallas_src>

<mosaic_0001>
module attributes {stable_mosaic.version = 11 : i64} {
  func.func @gru_kernel(%arg0: i32, %arg1: memref<8x8x384xf32, #tpu.memory_space<vmem>>, %arg2: memref<128x384xbf16, #tpu.memory_space<vmem>>, %arg3: memref<1x128xf32, #tpu.memory_space<vmem>>, %arg4: memref<8x8x128xf32, #tpu.memory_space<vmem>>, %arg5: memref<8x128xf32, #tpu.memory_space<vmem>>) attributes {dimension_semantics = [#tpu.dimension_semantics<arbitrary>], iteration_bounds = array<i64: 1>, scalar_prefetch = 0 : i64, scratch_operands = 0 : i64, tpu.core_type = #tpu.core_type<tc>, window_params = [{transform_indices = @transform_0, window_bounds = array<i64: 8, 8, 384>}, {pipeline_mode = #tpu.pipeline_mode<synchronous>, transform_indices = @transform_1, window_bounds = array<i64: 128, 384>}, {pipeline_mode = #tpu.pipeline_mode<synchronous>, transform_indices = @transform_2, window_bounds = array<i64: 1, 128>}, {transform_indices = @transform_3, window_bounds = array<i64: 8, 8, 128>}, {pipeline_mode = #tpu.pipeline_mode<synchronous>, transform_indices = @transform_4, window_bounds = array<i64: 8, 128>}]} {
    %c0_i32 = arith.constant 0 : i32
    %0 = arith.cmpi eq, %arg0, %c0_i32 : i32
    %1 = arith.extui %0 : i1 to i32
    %c0_i32_0 = arith.constant 0 : i32
    %2 = arith.cmpi ne, %1, %c0_i32_0 : i32
    scf.if %2 {
      %cst_72 = arith.constant 0.000000e+00 : f32
      %297 = vector.broadcast %cst_72 : f32 to vector<8x128xf32>
      %c0_73 = arith.constant 0 : index
      %c0_74 = arith.constant 0 : index
      %298 = vector.load %arg5[%c0_73, %c0_74] : memref<8x128xf32, #tpu.memory_space<vmem>>, vector<8x128xf32>
      tpu.vector_store %arg5[%c0_73, %c0_74], %297 {strides = array<i32>} : memref<8x128xf32, #tpu.memory_space<vmem>>, vector<8x128xf32>,
    } else {
    }
    %c0 = arith.constant 0 : index
    %c0_1 = arith.constant 0 : index
    %3 = vector.load %arg2[%c0, %c0_1] : memref<128x384xbf16, #tpu.memory_space<vmem>>, vector<128x384xbf16>
    %c0_2 = arith.constant 0 : index
    %c0_3 = arith.constant 0 : index
    %4 = vector.load %arg3[%c0_2, %c0_3] : memref<1x128xf32, #tpu.memory_space<vmem>>, vector<1x128xf32>
    %5 = vector.shape_cast %4 : vector<1x128xf32> to vector<1x128xf32>
    %6 = vector.broadcast %5 : vector<1x128xf32> to vector<8x128xf32>
    %c0_4 = arith.constant 0 : index
    %c0_5 = arith.constant 0 : index
    %7 = vector.load %arg5[%c0_4, %c0_5] : memref<8x128xf32, #tpu.memory_space<vmem>>, vector<8x128xf32>
    %c0_i32_6 = arith.constant 0 : i32
    %8 = arith.truncf %7 : vector<8x128xf32> to vector<8x128xbf16>
    %cst = arith.constant dense<0.000000e+00> : vector<8x384xf32>
    %9 = tpu.matmul %8, %3, %cst {dimension_numbers = #tpu.dot_dimension_numbers<[1], [0], [0], [1], [0, 0, 1, 1], [], []>} : vector<8x128xbf16>, vector<128x384xbf16>, vector<8x384xf32> -> vector<8x384xf32>
    %10 = arith.index_cast %c0_i32_6 : i32 to index
    %c0_7 = arith.constant 0 : index
    %c0_8 = arith.constant 0 : index
    %11 = vector.load %arg1[%10, %c0_7, %c0_8] : memref<8x8x384xf32, #tpu.memory_space<vmem>>, vector<1x8x384xf32>
    %12 = vector.shape_cast %11 : vector<1x8x384xf32> to vector<8x384xf32>
    %13 = vector.extract_strided_slice %12 {offsets = [0, 0], sizes = [8, 128], strides = [1, 1]} : vector<8x384xf32> to vector<8x128xf32>
    %14 = vector.extract_strided_slice %9 {offsets = [0, 0], sizes = [8, 128], strides = [1, 1]} : vector<8x384xf32> to vector<8x128xf32>
    %15 = arith.addf %13, %14 : vector<8x128xf32>
    %16 = arith.negf %15 : vector<8x128xf32>
    %17 = math.exp %16 : vector<8x128xf32>
    %cst_9 = arith.constant 1.000000e+00 : f32
    %18 = vector.broadcast %cst_9 : f32 to vector<8x128xf32>
    %19 = arith.addf %18, %17 : vector<8x128xf32>
    %20 = arith.divf %18, %19 : vector<8x128xf32>
    %21 = vector.extract_strided_slice %12 {offsets = [0, 128], sizes = [8, 128], strides = [1, 1]} : vector<8x384xf32> to vector<8x128xf32>
    %22 = vector.extract_strided_slice %9 {offsets = [0, 128], sizes = [8, 128], strides = [1, 1]} : vector<8x384xf32> to vector<8x128xf32>
    %23 = arith.addf %21, %22 : vector<8x128xf32>
    %24 = arith.negf %23 : vector<8x128xf32>
    %25 = math.exp %24 : vector<8x128xf32>
    %cst_10 = arith.constant 1.000000e+00 : f32
    %26 = vector.broadcast %cst_10 : f32 to vector<8x128xf32>
    %27 = arith.addf %26, %25 : vector<8x128xf32>
    %28 = arith.divf %26, %27 : vector<8x128xf32>
    %29 = vector.extract_strided_slice %12 {offsets = [0, 256], sizes = [8, 128], strides = [1, 1]} : vector<8x384xf32> to vector<8x128xf32>
    %30 = vector.extract_strided_slice %9 {offsets = [0, 256], sizes = [8, 128], strides = [1, 1]} : vector<8x384xf32> to vector<8x128xf32>
    %31 = arith.addf %30, %6 : vector<8x128xf32>
    %32 = arith.mulf %20, %31 : vector<8x128xf32>
    %33 = arith.addf %29, %32 : vector<8x128xf32>
    %34 = math.tanh %33 : vector<8x128xf32>
    %cst_11 = arith.constant 1.000000e+00 : f32
    %35 = vector.broadcast %cst_11 : f32 to vector<8x128xf32>
    %36 = arith.subf %35, %28 : vector<8x128xf32>
    %37 = arith.mulf %36, %34 : vector<8x128xf32>
    %38 = arith.mulf %28, %7 : vector<8x128xf32>
    %39 = arith.addf %37, %38 : vector<8x128xf32>
    %40 = arith.index_cast %c0_i32_6 : i32 to index
    %c0_12 = arith.constant 0 : index
    %c0_13 = arith.constant 0 : index
    %41 = vector.load %arg4[%40, %c0_12, %c0_13] : memref<8x8x128xf32, #tpu.memory_space<vmem>>, vector<1x8x128xf32>
    %42 = vector.shape_cast %41 : vector<1x8x128xf32> to vector<8x128xf32>
    %43 = vector.shape_cast %39 : vector<8x128xf32> to vector<1x8x128xf32>
    tpu.vector_store %arg4[%40, %c0_12, %c0_13], %43 {strides = array<i32>} : memref<8x8x128xf32, #tpu.memory_space<vmem>>, vector<1x8x128xf32>,
    %c1_i32 = arith.constant 1 : i32
    %44 = arith.truncf %39 : vector<8x128xf32> to vector<8x128xbf16>
    %cst_14 = arith.constant dense<0.000000e+00> : vector<8x384xf32>
    %45 = tpu.matmul %44, %3, %cst_14 {dimension_numbers = #tpu.dot_dimension_numbers<[1], [0], [0], [1], [0, 0, 1, 1], [], []>} : vector<8x128xbf16>, vector<128x384xbf16>, vector<8x384xf32> -> vector<8x384xf32>
    %46 = arith.index_cast %c1_i32 : i32 to index
    %c0_15 = arith.constant 0 : index
    %c0_16 = arith.constant 0 : index
    %47 = vector.load %arg1[%46, %c0_15, %c0_16] : memref<8x8x384xf32, #tpu.memory_space<vmem>>, vector<1x8x384xf32>
    %48 = vector.shape_cast %47 : vector<1x8x384xf32> to vector<8x384xf32>
    %49 = vector.extract_strided_slice %48 {offsets = [0, 0], sizes = [8, 128], strides = [1, 1]} : vector<8x384xf32> to vector<8x128xf32>
    %50 = vector.extract_strided_slice %45 {offsets = [0, 0], sizes = [8, 128], strides = [1, 1]} : vector<8x384xf32> to vector<8x128xf32>
    %51 = arith.addf %49, %50 : vector<8x128xf32>
    %52 = arith.negf %51 : vector<8x128xf32>
    %53 = math.exp %52 : vector<8x128xf32>
    %cst_17 = arith.constant 1.000000e+00 : f32
    %54 = vector.broadcast %cst_17 : f32 to vector<8x128xf32>
    %55 = arith.addf %54, %53 : vector<8x128xf32>
    %56 = arith.divf %54, %55 : vector<8x128xf32>
    %57 = vector.extract_strided_slice %48 {offsets = [0, 128], sizes = [8, 128], strides = [1, 1]} : vector<8x384xf32> to vector<8x128xf32>
    %58 = vector.extract_strided_slice %45 {offsets = [0, 128], sizes = [8, 128], strides = [1, 1]} : vector<8x384xf32> to vector<8x128xf32>
    %59 = arith.addf %57, %58 : vector<8x128xf32>
    %60 = arith.negf %59 : vector<8x128xf32>
    %61 = math.exp %60 : vector<8x128xf32>
    %cst_18 = arith.constant 1.000000e+00 : f32
    %62 = vector.broadcast %cst_18 : f32 to vector<8x128xf32>
    %63 = arith.addf %62, %61 : vector<8x128xf32>
    %64 = arith.divf %62, %63 : vector<8x128xf32>
    %65 = vector.extract_strided_slice %48 {offsets = [0, 256], sizes = [8, 128], strides = [1, 1]} : vector<8x384xf32> to vector<8x128xf32>
    %66 = vector.extract_strided_slice %45 {offsets = [0, 256], sizes = [8, 128], strides = [1, 1]} : vector<8x384xf32> to vector<8x128xf32>
    %67 = arith.addf %66, %6 : vector<8x128xf32>
    %68 = arith.mulf %56, %67 : vector<8x128xf32>
    %69 = arith.addf %65, %68 : vector<8x128xf32>
    %70 = math.tanh %69 : vector<8x128xf32>
    %cst_19 = arith.constant 1.000000e+00 : f32
    %71 = vector.broadcast %cst_19 : f32 to vector<8x128xf32>
    %72 = arith.subf %71, %64 : vector<8x128xf32>
    %73 = arith.mulf %72, %70 : vector<8x128xf32>
    %74 = arith.mulf %64, %39 : vector<8x128xf32>
    %75 = arith.addf %73, %74 : vector<8x128xf32>
    %76 = arith.index_cast %c1_i32 : i32 to index
    %c0_20 = arith.constant 0 : index
    %c0_21 = arith.constant 0 : index
    %77 = vector.load %arg4[%76, %c0_20, %c0_21] : memref<8x8x128xf32, #tpu.memory_space<vmem>>, vector<1x8x128xf32>
    %78 = vector.shape_cast %77 : vector<1x8x128xf32> to vector<8x128xf32>
    %79 = vector.shape_cast %75 : vector<8x128xf32> to vector<1x8x128xf32>
    tpu.vector_store %arg4[%76, %c0_20, %c0_21], %79 {strides = array<i32>} : memref<8x8x128xf32, #tpu.memory_space<vmem>>, vector<1x8x128xf32>,
    %c2_i32 = arith.constant 2 : i32
    %80 = arith.truncf %75 : vector<8x128xf32> to vector<8x128xbf16>
    %cst_22 = arith.constant dense<0.000000e+00> : vector<8x384xf32>
    %81 = tpu.matmul %80, %3, %cst_22 {dimension_numbers = #tpu.dot_dimension_numbers<[1], [0], [0], [1], [0, 0, 1, 1], [], []>} : vector<8x128xbf16>, vector<128x384xbf16>, vector<8x384xf32> -> vector<8x384xf32>
    %82 = arith.index_cast %c2_i32 : i32 to index
    %c0_23 = arith.constant 0 : index
    %c0_24 = arith.constant 0 : index
    %83 = vector.load %arg1[%82, %c0_23, %c0_24] : memref<8x8x384xf32, #tpu.memory_space<vmem>>, vector<1x8x384xf32>
    %84 = vector.shape_cast %83 : vector<1x8x384xf32> to vector<8x384xf32>
    %85 = vector.extract_strided_slice %84 {offsets = [0, 0], sizes = [8, 128], strides = [1, 1]} : vector<8x384xf32> to vector<8x128xf32>
    %86 = vector.extract_strided_slice %81 {offsets = [0, 0], sizes = [8, 128], strides = [1, 1]} : vector<8x384xf32> to vector<8x128xf32>
    %87 = arith.addf %85, %86 : vector<8x128xf32>
    %88 = arith.negf %87 : vector<8x128xf32>
    %89 = math.exp %88 : vector<8x128xf32>
    %cst_25 = arith.constant 1.000000e+00 : f32
    %90 = vector.broadcast %cst_25 : f32 to vector<8x128xf32>
    %91 = arith.addf %90, %89 : vector<8x128xf32>
    %92 = arith.divf %90, %91 : vector<8x128xf32>
    %93 = vector.extract_strided_slice %84 {offsets = [0, 128], sizes = [8, 128], strides = [1, 1]} : vector<8x384xf32> to vector<8x128xf32>
    %94 = vector.extract_strided_slice %81 {offsets = [0, 128], sizes = [8, 128], strides = [1, 1]} : vector<8x384xf32> to vector<8x128xf32>
    %95 = arith.addf %93, %94 : vector<8x128xf32>
    %96 = arith.negf %95 : vector<8x128xf32>
    %97 = math.exp %96 : vector<8x128xf32>
    %cst_26 = arith.constant 1.000000e+00 : f32
    %98 = vector.broadcast %cst_26 : f32 to vector<8x128xf32>
    %99 = arith.addf %98, %97 : vector<8x128xf32>
    %100 = arith.divf %98, %99 : vector<8x128xf32>
    %101 = vector.extract_strided_slice %84 {offsets = [0, 256], sizes = [8, 128], strides = [1, 1]} : vector<8x384xf32> to vector<8x128xf32>
    %102 = vector.extract_strided_slice %81 {offsets = [0, 256], sizes = [8, 128], strides = [1, 1]} : vector<8x384xf32> to vector<8x128xf32>
    %103 = arith.addf %102, %6 : vector<8x128xf32>
    %104 = arith.mulf %92, %103 : vector<8x128xf32>
    %105 = arith.addf %101, %104 : vector<8x128xf32>
    %106 = math.tanh %105 : vector<8x128xf32>
    %cst_27 = arith.constant 1.000000e+00 : f32
    %107 = vector.broadcast %cst_27 : f32 to vector<8x128xf32>
    %108 = arith.subf %107, %100 : vector<8x128xf32>
    %109 = arith.mulf %108, %106 : vector<8x128xf32>
    %110 = arith.mulf %100, %75 : vector<8x128xf32>
    %111 = arith.addf %109, %110 : vector<8x128xf32>
    %112 = arith.index_cast %c2_i32 : i32 to index
    %c0_28 = arith.constant 0 : index
    %c0_29 = arith.constant 0 : index
    %113 = vector.load %arg4[%112, %c0_28, %c0_29] : memref<8x8x128xf32, #tpu.memory_space<vmem>>, vector<1x8x128xf32>
    %114 = vector.shape_cast %113 : vector<1x8x128xf32> to vector<8x128xf32>
    %115 = vector.shape_cast %111 : vector<8x128xf32> to vector<1x8x128xf32>
    tpu.vector_store %arg4[%112, %c0_28, %c0_29], %115 {strides = array<i32>} : memref<8x8x128xf32, #tpu.memory_space<vmem>>, vector<1x8x128xf32>,
    %c3_i32 = arith.constant 3 : i32
    %116 = arith.truncf %111 : vector<8x128xf32> to vector<8x128xbf16>
    %cst_30 = arith.constant dense<0.000000e+00> : vector<8x384xf32>
    %117 = tpu.matmul %116, %3, %cst_30 {dimension_numbers = #tpu.dot_dimension_numbers<[1], [0], [0], [1], [0, 0, 1, 1], [], []>} : vector<8x128xbf16>, vector<128x384xbf16>, vector<8x384xf32> -> vector<8x384xf32>
    %118 = arith.index_cast %c3_i32 : i32 to index
    %c0_31 = arith.constant 0 : index
    %c0_32 = arith.constant 0 : index
    %119 = vector.load %arg1[%118, %c0_31, %c0_32] : memref<8x8x384xf32, #tpu.memory_space<vmem>>, vector<1x8x384xf32>
    %120 = vector.shape_cast %119 : vector<1x8x384xf32> to vector<8x384xf32>
    %121 = vector.extract_strided_slice %120 {offsets = [0, 0], sizes = [8, 128], strides = [1, 1]} : vector<8x384xf32> to vector<8x128xf32>
    %122 = vector.extract_strided_slice %117 {offsets = [0, 0], sizes = [8, 128], strides = [1, 1]} : vector<8x384xf32> to vector<8x128xf32>
    %123 = arith.addf %121, %122 : vector<8x128xf32>
    %124 = arith.negf %123 : vector<8x128xf32>
    %125 = math.exp %124 : vector<8x128xf32>
    %cst_33 = arith.constant 1.000000e+00 : f32
    %126 = vector.broadcast %cst_33 : f32 to vector<8x128xf32>
    %127 = arith.addf %126, %125 : vector<8x128xf32>
    %128 = arith.divf %126, %127 : vector<8x128xf32>
    %129 = vector.extract_strided_slice %120 {offsets = [0, 128], sizes = [8, 128], strides = [1, 1]} : vector<8x384xf32> to vector<8x128xf32>
    %130 = vector.extract_strided_slice %117 {offsets = [0, 128], sizes = [8, 128], strides = [1, 1]} : vector<8x384xf32> to vector<8x128xf32>
    %131 = arith.addf %129, %130 : vector<8x128xf32>
    %132 = arith.negf %131 : vector<8x128xf32>
    %133 = math.exp %132 : vector<8x128xf32>
    %cst_34 = arith.constant 1.000000e+00 : f32
    %134 = vector.broadcast %cst_34 : f32 to vector<8x128xf32>
    %135 = arith.addf %134, %133 : vector<8x128xf32>
    %136 = arith.divf %134, %135 : vector<8x128xf32>
    %137 = vector.extract_strided_slice %120 {offsets = [0, 256], sizes = [8, 128], strides = [1, 1]} : vector<8x384xf32> to vector<8x128xf32>
    %138 = vector.extract_strided_slice %117 {offsets = [0, 256], sizes = [8, 128], strides = [1, 1]} : vector<8x384xf32> to vector<8x128xf32>
    %139 = arith.addf %138, %6 : vector<8x128xf32>
    %140 = arith.mulf %128, %139 : vector<8x128xf32>
    %141 = arith.addf %137, %140 : vector<8x128xf32>
    %142 = math.tanh %141 : vector<8x128xf32>
    %cst_35 = arith.constant 1.000000e+00 : f32
    %143 = vector.broadcast %cst_35 : f32 to vector<8x128xf32>
    %144 = arith.subf %143, %136 : vector<8x128xf32>
    %145 = arith.mulf %144, %142 : vector<8x128xf32>
    %146 = arith.mulf %136, %111 : vector<8x128xf32>
    %147 = arith.addf %145, %146 : vector<8x128xf32>
    %148 = arith.index_cast %c3_i32 : i32 to index
    %c0_36 = arith.constant 0 : index
    %c0_37 = arith.constant 0 : index
    %149 = vector.load %arg4[%148, %c0_36, %c0_37] : memref<8x8x128xf32, #tpu.memory_space<vmem>>, vector<1x8x128xf32>
    %150 = vector.shape_cast %149 : vector<1x8x128xf32> to vector<8x128xf32>
    %151 = vector.shape_cast %147 : vector<8x128xf32> to vector<1x8x128xf32>
    tpu.vector_store %arg4[%148, %c0_36, %c0_37], %151 {strides = array<i32>} : memref<8x8x128xf32, #tpu.memory_space<vmem>>, vector<1x8x128xf32>,
    %c4_i32 = arith.constant 4 : i32
    %152 = arith.truncf %147 : vector<8x128xf32> to vector<8x128xbf16>
    %cst_38 = arith.constant dense<0.000000e+00> : vector<8x384xf32>
    %153 = tpu.matmul %152, %3, %cst_38 {dimension_numbers = #tpu.dot_dimension_numbers<[1], [0], [0], [1], [0, 0, 1, 1], [], []>} : vector<8x128xbf16>, vector<128x384xbf16>, vector<8x384xf32> -> vector<8x384xf32>
    %154 = arith.index_cast %c4_i32 : i32 to index
    %c0_39 = arith.constant 0 : index
    %c0_40 = arith.constant 0 : index
    %155 = vector.load %arg1[%154, %c0_39, %c0_40] : memref<8x8x384xf32, #tpu.memory_space<vmem>>, vector<1x8x384xf32>
    %156 = vector.shape_cast %155 : vector<1x8x384xf32> to vector<8x384xf32>
    %157 = vector.extract_strided_slice %156 {offsets = [0, 0], sizes = [8, 128], strides = [1, 1]} : vector<8x384xf32> to vector<8x128xf32>
    %158 = vector.extract_strided_slice %153 {offsets = [0, 0], sizes = [8, 128], strides = [1, 1]} : vector<8x384xf32> to vector<8x128xf32>
    %159 = arith.addf %157, %158 : vector<8x128xf32>
    %160 = arith.negf %159 : vector<8x128xf32>
    %161 = math.exp %160 : vector<8x128xf32>
    %cst_41 = arith.constant 1.000000e+00 : f32
    %162 = vector.broadcast %cst_41 : f32 to vector<8x128xf32>
    %163 = arith.addf %162, %161 : vector<8x128xf32>
    %164 = arith.divf %162, %163 : vector<8x128xf32>
    %165 = vector.extract_strided_slice %156 {offsets = [0, 128], sizes = [8, 128], strides = [1, 1]} : vector<8x384xf32> to vector<8x128xf32>
    %166 = vector.extract_strided_slice %153 {offsets = [0, 128], sizes = [8, 128], strides = [1, 1]} : vector<8x384xf32> to vector<8x128xf32>
    %167 = arith.addf %165, %166 : vector<8x128xf32>
    %168 = arith.negf %167 : vector<8x128xf32>
    %169 = math.exp %168 : vector<8x128xf32>
    %cst_42 = arith.constant 1.000000e+00 : f32
    %170 = vector.broadcast %cst_42 : f32 to vector<8x128xf32>
    %171 = arith.addf %170, %169 : vector<8x128xf32>
    %172 = arith.divf %170, %171 : vector<8x128xf32>
    %173 = vector.extract_strided_slice %156 {offsets = [0, 256], sizes = [8, 128], strides = [1, 1]} : vector<8x384xf32> to vector<8x128xf32>
    %174 = vector.extract_strided_slice %153 {offsets = [0, 256], sizes = [8, 128], strides = [1, 1]} : vector<8x384xf32> to vector<8x128xf32>
    %175 = arith.addf %174, %6 : vector<8x128xf32>
    %176 = arith.mulf %164, %175 : vector<8x128xf32>
    %177 = arith.addf %173, %176 : vector<8x128xf32>
    %178 = math.tanh %177 : vector<8x128xf32>
    %cst_43 = arith.constant 1.000000e+00 : f32
    %179 = vector.broadcast %cst_43 : f32 to vector<8x128xf32>
    %180 = arith.subf %179, %172 : vector<8x128xf32>
    %181 = arith.mulf %180, %178 : vector<8x128xf32>
    %182 = arith.mulf %172, %147 : vector<8x128xf32>
    %183 = arith.addf %181, %182 : vector<8x128xf32>
    %184 = arith.index_cast %c4_i32 : i32 to index
    %c0_44 = arith.constant 0 : index
    %c0_45 = arith.constant 0 : index
    %185 = vector.load %arg4[%184, %c0_44, %c0_45] : memref<8x8x128xf32, #tpu.memory_space<vmem>>, vector<1x8x128xf32>
    %186 = vector.shape_cast %185 : vector<1x8x128xf32> to vector<8x128xf32>
    %187 = vector.shape_cast %183 : vector<8x128xf32> to vector<1x8x128xf32>
    tpu.vector_store %arg4[%184, %c0_44, %c0_45], %187 {strides = array<i32>} : memref<8x8x128xf32, #tpu.memory_space<vmem>>, vector<1x8x128xf32>,
    %c5_i32 = arith.constant 5 : i32
    %188 = arith.truncf %183 : vector<8x128xf32> to vector<8x128xbf16>
    %cst_46 = arith.constant dense<0.000000e+00> : vector<8x384xf32>
    %189 = tpu.matmul %188, %3, %cst_46 {dimension_numbers = #tpu.dot_dimension_numbers<[1], [0], [0], [1], [0, 0, 1, 1], [], []>} : vector<8x128xbf16>, vector<128x384xbf16>, vector<8x384xf32> -> vector<8x384xf32>
    %190 = arith.index_cast %c5_i32 : i32 to index
    %c0_47 = arith.constant 0 : index
    %c0_48 = arith.constant 0 : index
    %191 = vector.load %arg1[%190, %c0_47, %c0_48] : memref<8x8x384xf32, #tpu.memory_space<vmem>>, vector<1x8x384xf32>
    %192 = vector.shape_cast %191 : vector<1x8x384xf32> to vector<8x384xf32>
    %193 = vector.extract_strided_slice %192 {offsets = [0, 0], sizes = [8, 128], strides = [1, 1]} : vector<8x384xf32> to vector<8x128xf32>
    %194 = vector.extract_strided_slice %189 {offsets = [0, 0], sizes = [8, 128], strides = [1, 1]} : vector<8x384xf32> to vector<8x128xf32>
    %195 = arith.addf %193, %194 : vector<8x128xf32>
    %196 = arith.negf %195 : vector<8x128xf32>
    %197 = math.exp %196 : vector<8x128xf32>
    %cst_49 = arith.constant 1.000000e+00 : f32
    %198 = vector.broadcast %cst_49 : f32 to vector<8x128xf32>
    %199 = arith.addf %198, %197 : vector<8x128xf32>
    %200 = arith.divf %198, %199 : vector<8x128xf32>
    %201 = vector.extract_strided_slice %192 {offsets = [0, 128], sizes = [8, 128], strides = [1, 1]} : vector<8x384xf32> to vector<8x128xf32>
    %202 = vector.extract_strided_slice %189 {offsets = [0, 128], sizes = [8, 128], strides = [1, 1]} : vector<8x384xf32> to vector<8x128xf32>
    %203 = arith.addf %201, %202 : vector<8x128xf32>
    %204 = arith.negf %203 : vector<8x128xf32>
    %205 = math.exp %204 : vector<8x128xf32>
    %cst_50 = arith.constant 1.000000e+00 : f32
    %206 = vector.broadcast %cst_50 : f32 to vector<8x128xf32>
    %207 = arith.addf %206, %205 : vector<8x128xf32>
    %208 = arith.divf %206, %207 : vector<8x128xf32>
    %209 = vector.extract_strided_slice %192 {offsets = [0, 256], sizes = [8, 128], strides = [1, 1]} : vector<8x384xf32> to vector<8x128xf32>
    %210 = vector.extract_strided_slice %189 {offsets = [0, 256], sizes = [8, 128], strides = [1, 1]} : vector<8x384xf32> to vector<8x128xf32>
    %211 = arith.addf %210, %6 : vector<8x128xf32>
    %212 = arith.mulf %200, %211 : vector<8x128xf32>
    %213 = arith.addf %209, %212 : vector<8x128xf32>
    %214 = math.tanh %213 : vector<8x128xf32>
    %cst_51 = arith.constant 1.000000e+00 : f32
    %215 = vector.broadcast %cst_51 : f32 to vector<8x128xf32>
    %216 = arith.subf %215, %208 : vector<8x128xf32>
    %217 = arith.mulf %216, %214 : vector<8x128xf32>
    %218 = arith.mulf %208, %183 : vector<8x128xf32>
    %219 = arith.addf %217, %218 : vector<8x128xf32>
    %220 = arith.index_cast %c5_i32 : i32 to index
    %c0_52 = arith.constant 0 : index
    %c0_53 = arith.constant 0 : index
    %221 = vector.load %arg4[%220, %c0_52, %c0_53] : memref<8x8x128xf32, #tpu.memory_space<vmem>>, vector<1x8x128xf32>
    %222 = vector.shape_cast %221 : vector<1x8x128xf32> to vector<8x128xf32>
    %223 = vector.shape_cast %219 : vector<8x128xf32> to vector<1x8x128xf32>
    tpu.vector_store %arg4[%220, %c0_52, %c0_53], %223 {strides = array<i32>} : memref<8x8x128xf32, #tpu.memory_space<vmem>>, vector<1x8x128xf32>,
    %c6_i32 = arith.constant 6 : i32
    %224 = arith.truncf %219 : vector<8x128xf32> to vector<8x128xbf16>
    %cst_54 = arith.constant dense<0.000000e+00> : vector<8x384xf32>
    %225 = tpu.matmul %224, %3, %cst_54 {dimension_numbers = #tpu.dot_dimension_numbers<[1], [0], [0], [1], [0, 0, 1, 1], [], []>} : vector<8x128xbf16>, vector<128x384xbf16>, vector<8x384xf32> -> vector<8x384xf32>
    %226 = arith.index_cast %c6_i32 : i32 to index
    %c0_55 = arith.constant 0 : index
    %c0_56 = arith.constant 0 : index
    %227 = vector.load %arg1[%226, %c0_55, %c0_56] : memref<8x8x384xf32, #tpu.memory_space<vmem>>, vector<1x8x384xf32>
    %228 = vector.shape_cast %227 : vector<1x8x384xf32> to vector<8x384xf32>
    %229 = vector.extract_strided_slice %228 {offsets = [0, 0], sizes = [8, 128], strides = [1, 1]} : vector<8x384xf32> to vector<8x128xf32>
    %230 = vector.extract_strided_slice %225 {offsets = [0, 0], sizes = [8, 128], strides = [1, 1]} : vector<8x384xf32> to vector<8x128xf32>
    %231 = arith.addf %229, %230 : vector<8x128xf32>
    %232 = arith.negf %231 : vector<8x128xf32>
    %233 = math.exp %232 : vector<8x128xf32>
    %cst_57 = arith.constant 1.000000e+00 : f32
    %234 = vector.broadcast %cst_57 : f32 to vector<8x128xf32>
    %235 = arith.addf %234, %233 : vector<8x128xf32>
    %236 = arith.divf %234, %235 : vector<8x128xf32>
    %237 = vector.extract_strided_slice %228 {offsets = [0, 128], sizes = [8, 128], strides = [1, 1]} : vector<8x384xf32> to vector<8x128xf32>
    %238 = vector.extract_strided_slice %225 {offsets = [0, 128], sizes = [8, 128], strides = [1, 1]} : vector<8x384xf32> to vector<8x128xf32>
    %239 = arith.addf %237, %238 : vector<8x128xf32>
    %240 = arith.negf %239 : vector<8x128xf32>
    %241 = math.exp %240 : vector<8x128xf32>
    %cst_58 = arith.constant 1.000000e+00 : f32
    %242 = vector.broadcast %cst_58 : f32 to vector<8x128xf32>
    %243 = arith.addf %242, %241 : vector<8x128xf32>
    %244 = arith.divf %242, %243 : vector<8x128xf32>
    %245 = vector.extract_strided_slice %228 {offsets = [0, 256], sizes = [8, 128], strides = [1, 1]} : vector<8x384xf32> to vector<8x128xf32>
    %246 = vector.extract_strided_slice %225 {offsets = [0, 256], sizes = [8, 128], strides = [1, 1]} : vector<8x384xf32> to vector<8x128xf32>
    %247 = arith.addf %246, %6 : vector<8x128xf32>
    %248 = arith.mulf %236, %247 : vector<8x128xf32>
    %249 = arith.addf %245, %248 : vector<8x128xf32>
    %250 = math.tanh %249 : vector<8x128xf32>
    %cst_59 = arith.constant 1.000000e+00 : f32
    %251 = vector.broadcast %cst_59 : f32 to vector<8x128xf32>
    %252 = arith.subf %251, %244 : vector<8x128xf32>
    %253 = arith.mulf %252, %250 : vector<8x128xf32>
    %254 = arith.mulf %244, %219 : vector<8x128xf32>
    %255 = arith.addf %253, %254 : vector<8x128xf32>
    %256 = arith.index_cast %c6_i32 : i32 to index
    %c0_60 = arith.constant 0 : index
    %c0_61 = arith.constant 0 : index
    %257 = vector.load %arg4[%256, %c0_60, %c0_61] : memref<8x8x128xf32, #tpu.memory_space<vmem>>, vector<1x8x128xf32>
    %258 = vector.shape_cast %257 : vector<1x8x128xf32> to vector<8x128xf32>
    %259 = vector.shape_cast %255 : vector<8x128xf32> to vector<1x8x128xf32>
    tpu.vector_store %arg4[%256, %c0_60, %c0_61], %259 {strides = array<i32>} : memref<8x8x128xf32, #tpu.memory_space<vmem>>, vector<1x8x128xf32>,
    %c7_i32 = arith.constant 7 : i32
    %260 = arith.truncf %255 : vector<8x128xf32> to vector<8x128xbf16>
    %cst_62 = arith.constant dense<0.000000e+00> : vector<8x384xf32>
    %261 = tpu.matmul %260, %3, %cst_62 {dimension_numbers = #tpu.dot_dimension_numbers<[1], [0], [0], [1], [0, 0, 1, 1], [], []>} : vector<8x128xbf16>, vector<128x384xbf16>, vector<8x384xf32> -> vector<8x384xf32>
    %262 = arith.index_cast %c7_i32 : i32 to index
    %c0_63 = arith.constant 0 : index
    %c0_64 = arith.constant 0 : index
    %263 = vector.load %arg1[%262, %c0_63, %c0_64] : memref<8x8x384xf32, #tpu.memory_space<vmem>>, vector<1x8x384xf32>
    %264 = vector.shape_cast %263 : vector<1x8x384xf32> to vector<8x384xf32>
    %265 = vector.extract_strided_slice %264 {offsets = [0, 0], sizes = [8, 128], strides = [1, 1]} : vector<8x384xf32> to vector<8x128xf32>
    %266 = vector.extract_strided_slice %261 {offsets = [0, 0], sizes = [8, 128], strides = [1, 1]} : vector<8x384xf32> to vector<8x128xf32>
    %267 = arith.addf %265, %266 : vector<8x128xf32>
    %268 = arith.negf %267 : vector<8x128xf32>
    %269 = math.exp %268 : vector<8x128xf32>
    %cst_65 = arith.constant 1.000000e+00 : f32
    %270 = vector.broadcast %cst_65 : f32 to vector<8x128xf32>
    %271 = arith.addf %270, %269 : vector<8x128xf32>
    %272 = arith.divf %270, %271 : vector<8x128xf32>
    %273 = vector.extract_strided_slice %264 {offsets = [0, 128], sizes = [8, 128], strides = [1, 1]} : vector<8x384xf32> to vector<8x128xf32>
    %274 = vector.extract_strided_slice %261 {offsets = [0, 128], sizes = [8, 128], strides = [1, 1]} : vector<8x384xf32> to vector<8x128xf32>
    %275 = arith.addf %273, %274 : vector<8x128xf32>
    %276 = arith.negf %275 : vector<8x128xf32>
    %277 = math.exp %276 : vector<8x128xf32>
    %cst_66 = arith.constant 1.000000e+00 : f32
    %278 = vector.broadcast %cst_66 : f32 to vector<8x128xf32>
    %279 = arith.addf %278, %277 : vector<8x128xf32>
    %280 = arith.divf %278, %279 : vector<8x128xf32>
    %281 = vector.extract_strided_slice %264 {offsets = [0, 256], sizes = [8, 128], strides = [1, 1]} : vector<8x384xf32> to vector<8x128xf32>
    %282 = vector.extract_strided_slice %261 {offsets = [0, 256], sizes = [8, 128], strides = [1, 1]} : vector<8x384xf32> to vector<8x128xf32>
    %283 = arith.addf %282, %6 : vector<8x128xf32>
    %284 = arith.mulf %272, %283 : vector<8x128xf32>
    %285 = arith.addf %281, %284 : vector<8x128xf32>
    %286 = math.tanh %285 : vector<8x128xf32>
    %cst_67 = arith.constant 1.000000e+00 : f32
    %287 = vector.broadcast %cst_67 : f32 to vector<8x128xf32>
    %288 = arith.subf %287, %280 : vector<8x128xf32>
    %289 = arith.mulf %288, %286 : vector<8x128xf32>
    %290 = arith.mulf %280, %255 : vector<8x128xf32>
    %291 = arith.addf %289, %290 : vector<8x128xf32>
    %292 = arith.index_cast %c7_i32 : i32 to index
    %c0_68 = arith.constant 0 : index
    %c0_69 = arith.constant 0 : index
    %293 = vector.load %arg4[%292, %c0_68, %c0_69] : memref<8x8x128xf32, #tpu.memory_space<vmem>>, vector<1x8x128xf32>
    %294 = vector.shape_cast %293 : vector<1x8x128xf32> to vector<8x128xf32>
    %295 = vector.shape_cast %291 : vector<8x128xf32> to vector<1x8x128xf32>
    tpu.vector_store %arg4[%292, %c0_68, %c0_69], %295 {strides = array<i32>} : memref<8x8x128xf32, #tpu.memory_space<vmem>>, vector<1x8x128xf32>,
    %c8_i32 = arith.constant 8 : i32
    %c0_70 = arith.constant 0 : index
    %c0_71 = arith.constant 0 : index
    %296 = vector.load %arg5[%c0_70, %c0_71] : memref<8x128xf32, #tpu.memory_space<vmem>>, vector<8x128xf32>
    tpu.vector_store %arg5[%c0_70, %c0_71], %291 {strides = array<i32>} : memref<8x128xf32, #tpu.memory_space<vmem>>, vector<8x128xf32>,
    return
  }
  func.func @transform_0(%arg0: i32) -> (i32, i32, i32) {
    %c0_i32 = arith.constant 0 : i32
    %c0_i32_0 = arith.constant 0 : i32
    %c0_i32_1 = arith.constant 0 : i32
    return %arg0, %c0_i32, %c0_i32_0 : i32, i32, i32
  }
  func.func @transform_1(%arg0: i32) -> (i32, i32) {
    %c0_i32 = arith.constant 0 : i32
    %c0_i32_0 = arith.constant 0 : i32
    %c0_i32_1 = arith.constant 0 : i32
    return %c0_i32, %c0_i32_0 : i32, i32
  }
  func.func @transform_2(%arg0: i32) -> (i32, i32) {
    %c0_i32 = arith.constant 0 : i32
    %c0_i32_0 = arith.constant 0 : i32
    %c0_i32_1 = arith.constant 0 : i32
    return %c0_i32, %c0_i32_0 : i32, i32
  }
  func.func @transform_3(%arg0: i32) -> (i32, i32, i32) {
    %c0_i32 = arith.constant 0 : i32
    %c0_i32_0 = arith.constant 0 : i32
    %c0_i32_1 = arith.constant 0 : i32
    return %arg0, %c0_i32, %c0_i32_0 : i32, i32, i32
  }
  func.func @transform_4(%arg0: i32) -> (i32, i32) {
    %c0_i32 = arith.constant 0 : i32
    %c0_i32_0 = arith.constant 0 : i32
    %c0_i32_1 = arith.constant 0 : i32
    return %c0_i32, %c0_i32_0 : i32, i32
  }
}

</mosaic_0001>

<bundles_post_ra>
// kernel: tpu_custom_call.1
= control target key start
LH: loop header
LB: loop body
LE: loop exit
PB: predicated region body
PF: predicated region fallthrough
CT: control target
= control target key end

     0   :  { %10 = vsyncpa [#allocation3], 0  ;;  %s2096_s0 = inlined_call_operand.hbm [shape: f32[8,8,384], index: 0, kind: input, shape index: {}]   ;;  %s2097_s1 = inlined_call_operand.hbm [shape: bf16[128,384], index: 1, kind: input, shape index: {}]   ;;  %s2098_s2 = inlined_call_operand.vmem [shape: f32[1,128], index: 2, kind: input, shape index: {}]   ;;  %s2099_s3 = inlined_call_operand.hbm [shape: f32[8,8,128], index: 3, kind: output, shape index: {0}]   ;;  %s2100_s4 = inlined_call_operand.hbm [shape: f32[8,128], index: 4, kind: output, shape index: {1}]  }
   0x1   :  { %11 = vsyncpa [#allocation6], 0 }
   0x2   :  { %12 = vsyncpa [#allocation4], 0 }
   0x3   :  { %13 = vsyncpa [#allocation9], 0  ;;  %s1631_s15 = smov [#allocation2]   ;;  %s1535_s19 = scalar_lea.hbm %s2096_s0, 3072 }
   0x4   :  { %s19_s16 = sshll.u32 %s1631_s15, 4  ;;  %p1536_p0 = scmp.ne.s32.totalorder %s2096_s0, %s1535_s19  ;;  %s20_s16 = int_to_ptr.vmem [resolvable:$true] %s19_s16 }
   0x5   :  { %p1539_p1 = scmp.lt.u32.totalorder %s1535_s19, %s2096_s0 }
   0x7   :  { %p1541_p2 = pnand %p1539_p1, %p1536_p0 }
   0x9   :  { %1544 = shalt.err (!%p1541_p2)
}
   0xa   :  { %s1545_s24 = scalar_lea.vmem %s20_s16, 3072  ;;  %p1550_p4 = scmp.lt.s32.totalorder %s20_s16, %s20_s16 }
   0xb   :  { %p1546_p3 = scmp.ne.s32.totalorder %s20_s16, %s1545_s24  ;;  %p1551_p5 = scmp.lt.s32.totalorder %s1545_s24, %s1545_s24 }
   0xd   :  { %p1552_p6 = por %p1551_p5, %p1550_p4 }
   0xf   :  { %p1553_p7 = pnand %p1552_p6, %p1546_p3 }
  0x11   :  { %1556 = shalt.err (!%p1553_p7)
}
  0x12   :  { %s1632_s25 = smov 384   ;;  %s1633_s26 = smov 24  }
  0x13   :  { %25 = dma.hbm_to_vmem [thread:$0]  %s2096_s0, 3072, %s20_s16, [#allocation3], %s1632_s25, %s1632_s25, %s1633_s26  }
  0x14   :  { %s1634_s29 = smov [#allocation5]   ;;  %s1557_s7 = scalar_lea.hbm %s2097_s1, 3072 }
  0x15   :  { %s31_s30 = sshll.u32 %s1634_s29, 4  ;;  %p1558_p8 = scmp.ne.s32.totalorder %s2097_s1, %s1557_s7  ;;  %s32_s30 = int_to_ptr.vmem [resolvable:$true] %s31_s30 }
  0x16   :  { %p1561_p9 = scmp.lt.u32.totalorder %s1557_s7, %s2097_s1 }
  0x18   :  { %p1563_p10 = pnand %p1561_p9, %p1558_p8 }
  0x1a   :  { %1566 = shalt.err (!%p1563_p10)
}
  0x1b   :  { %s1567_s12 = scalar_lea.vmem %s32_s30, 3072  ;;  %p1572_p12 = scmp.lt.s32.totalorder %s32_s30, %s32_s30 }
  0x1c   :  { %p1568_p11 = scmp.ne.s32.totalorder %s32_s30, %s1567_s12  ;;  %p1573_p13 = scmp.lt.s32.totalorder %s1567_s12, %s1567_s12 }
  0x1e   :  { %p1574_p0 = por %p1573_p13, %p1572_p12 }
  0x20   :  { %p1575_p1 = pnand %p1574_p0, %p1568_p11 }
  0x22   :  { %1578 = shalt.err (!%p1575_p1)
}
  0x23   :  { %s1635_s0 = smov 192   ;;  %s1636_s13 = smov 12  }
  0x24   :  { %37 = dma.hbm_to_vmem [thread:$0]  %s2097_s1, 3072, %s32_s30, [#allocation6], %s1635_s0, %s1635_s0, %s1636_s13  }
  0x25   :  { %1623 = dma.done.wait [#allocation3], 3072  }
  0x26   :  { %1624 = vsyncadd [#allocation3], 4294964224 }
  0x27   :  { %1625 = dma.done.wait [#allocation6], 3072  }
  0x28   :  { %1626 = vsyncadd [#allocation6], 4294964224  ;;  %v1637_v0 = vmov 0.0   ;;  %v1638_v1 = vmov 0   ;;  %vm1639_vm0 = vmmov 0   ;;  %v1640_v25 = vmov 0.0|0.0  }
  0x29   :  { %1244 = vmatprep.subr.bf16.mxu1 %v1637_v0  ;;  %253 = vmatprep.mubr.bf16.mxu0 %v1638_v1  ;;  %v1698_v2 = vld [vmem:[#allocation5 + $0x4] ss:$12 sps:$4 sm:$0xff]   ;;  %v1700_v3 = vld [vmem:[#allocation5] ss:$12 sps:$4 sm:$0xff]   ;;  %v1703_v4 = vld [vmem:[#allocation5 + $0x1c] ss:$12 sps:$4 sm:$0xff]  }
  0x2a   :  { %1260 = vmatprep.mubr.msk.bf16.mxu1 %vm1639_vm0, %v1637_v0  ;;  %221 = vmatprep.subr.bf16.mxu0 %v1698_v2  ;;  %v1706_v5 = vld [vmem:[#allocation5 + $0x18] ss:$12 sps:$4 sm:$0xff]   ;;  %v1709_v6 = vld [vmem:[#allocation5 + $0x34] ss:$12 sps:$4 sm:$0xff]   ;;  %v1712_v7 = vld [vmem:[#allocation5 + $0x30] ss:$12 sps:$4 sm:$0xff]  }
  0x2b   :  { %222 = vmatpush1.bf16.msra.mxu0 %v1700_v3  ;;  %v1715_v8 = vld [vmem:[#allocation5 + $0x4c] ss:$12 sps:$4 sm:$0xff]   ;;  %v1717_v9 = vld [vmem:[#allocation5 + $0x8] ss:$12 sps:$4 sm:$0xff]   ;;  %v1724_v11 = vld [vmem:[#allocation5 + $0x64] ss:$12 sps:$4 sm:$0xff]  }
  0x2c   :  { %223 = vmatprep.subr.bf16.mxu0 %v1703_v4  ;;  %v1720_v10 = vld [vmem:[#allocation5 + $0x48] ss:$12 sps:$4 sm:$0xff]   ;;  %1245 = vmatpush3.bf16.msra.mxu1 %v1717_v9  ;;  %v1727_v12 = vld [vmem:[#allocation5 + $0x20] ss:$12 sps:$4 sm:$0xff]   ;;  %v1733_v14 = vld [vmem:[#allocation5 + $0x38] ss:$12 sps:$4 sm:$0xff]  }
  0x2d   :  { %1246 = vmatprep.subr.bf16.mxu1 %v1637_v0  ;;  %v1729_v13 = vld [vmem:[#allocation5 + $0x60] ss:$12 sps:$4 sm:$0xff]   ;;  %v1736_v15 = vld [vmem:[#allocation5 + $0x7c] ss:$12 sps:$4 sm:$0xff]   ;;  %v1740_v16 = vld [vmem:[#allocation5 + $0x78] ss:$12 sps:$4 sm:$0xff]  }
  0x2e   :  { %v1743_v17 = vld [vmem:[#allocation5 + $0x50] ss:$12 sps:$4 sm:$0xff]   ;;  %v1746_v18 = vld [vmem:[#allocation5 + $0x94] ss:$12 sps:$4 sm:$0xff]   ;;  %v1756_v21 = vld [vmem:[#allocation5 + $0xac] ss:$12 sps:$4 sm:$0xff]  }
  0x2f   :  { %224 = vmatpush1.bf16.msra.mxu0 %v1706_v5  ;;  %v1750_v19 = vld [vmem:[#allocation5 + $0x90] ss:$12 sps:$4 sm:$0xff]   ;;  %v1753_v20 = vld [vmem:[#allocation5 + $0x68] ss:$12 sps:$4 sm:$0xff]   ;;  %v1763_v23 = vld [vmem:[#allocation5 + $0x80] ss:$12 sps:$4 sm:$0xff]  }
  0x30   :  { %225 = vmatprep.subr.bf16.mxu0 %v1709_v6  ;;  %1247 = vmatpush3.bf16.msra.mxu1 %v1727_v12  ;;  %v1760_v22 = vld [vmem:[#allocation5 + $0xa8] ss:$12 sps:$4 sm:$0xff]   ;;  %v1769_v24 = vld [vmem:[#allocation5 + $0x98] ss:$12 sps:$4 sm:$0xff]   ;;  %v1774_v26 = vld [vmem:[#allocation5 + $0xb0] ss:$12 sps:$4 sm:$0xff]  }
  0x31   :  { %1248 = vmatprep.subr.bf16.mxu1 %v1637_v0  ;;  %v302_v27 = vld [vmem:[#allocation2] sm:$0xff]  ;;  %v303_v31 = vld [vmem:[#allocation2 + $0x8] sm:$0xff]  ;;  %v304_v48 = vld [vmem:[#allocation2 + $0x10] sm:$0xff]  ;;  %s1642_s18 = smov [#allocation8]  }
  0x32   :  { %v1817_v44 = vld [vmem:[%s2098_s2] ss:$0 sm:$0xff]  ;;  %v411_v58 = vld [vmem:[#allocation2 + $0x18] sm:$0xff]  ;;  %s1641_s2 = smov [#allocation7]   ;;  %s1117_s19 = sshll.u32 %s1642_s18, 4  ;;  %s2065_s19 = int_to_ptr.vmem [resolvable:$true] %s1117_s19 }
  0x33   :  { %226 = vmatpush1.bf16.msra.mxu0 %v1712_v7  ;;  %v412_v63 = vld [vmem:[#allocation2 + $0x20] sm:$0xff]  ;;  %s1104_s17 = sshll.u32 %s1641_s2, 4  ;;  %s1105_s17 = int_to_ptr.vmem [resolvable:$true] %s1104_s17 }
  0x34   :  { %227 = vmatprep.subr.bf16.mxu0 %v1715_v8  ;;  %1249 = vmatpush3.bf16.msra.mxu1 %v1733_v14  ;;  %s1579_s20 = scalar_lea.vmem %s1105_s17, 1024  ;;  %p1584_p3 = scmp.lt.s32.totalorder %s1105_s17, %s1105_s17 }
  0x35   :  { %1250 = vmatprep.subr.bf16.mxu1 %v1637_v0  ;;  %p1580_p2 = scmp.ne.s32.totalorder %s1105_s17, %s1579_s20  ;;  %p1585_p4 = scmp.lt.s32.totalorder %s1579_s20, %s1579_s20 }
  0x37   :  { %228 = vmatpush1.bf16.msra.mxu0 %v1720_v10  ;;  %p1586_p5 = por %p1585_p4, %p1584_p3 }
  0x38   :  { %229 = vmatprep.subr.bf16.mxu0 %v1724_v11  ;;  %1251 = vmatpush3.bf16.msra.mxu1 %v1743_v17 }
  0x39   :  { %1252 = vmatprep.subr.bf16.mxu1 %v1637_v0  ;;  %p1587_p6 = pnand %p1586_p5, %p1580_p2 }
  0x3b   :  { %230 = vmatpush1.bf16.msra.mxu0 %v1729_v13 }
  0x3c   :  { %231 = vmatprep.subr.bf16.mxu0 %v1736_v15  ;;  %1253 = vmatpush3.bf16.msra.mxu1 %v1753_v20 }
  0x3d   :  { %1254 = vmatprep.subr.bf16.mxu1 %v1637_v0 }
  0x3f   :  { %232 = vmatpush1.bf16.msra.mxu0 %v1740_v16 }
  0x40   :  { %233 = vmatprep.subr.bf16.mxu0 %v1746_v18  ;;  %1255 = vmatpush3.bf16.msra.mxu1 %v1763_v23 }
  0x41   :  { %1256 = vmatprep.subr.bf16.mxu1 %v1637_v0 }
  0x43   :  { %234 = vmatpush1.bf16.msra.mxu0 %v1750_v19 }
  0x44   :  { %235 = vmatprep.subr.bf16.mxu0 %v1756_v21  ;;  %1257 = vmatpush3.bf16.msra.mxu1 %v1769_v24 }
  0x45   :  { %1258 = vmatprep.subr.bf16.mxu1 %v1637_v0 }
  0x47   :  { %236 = vmatpush1.bf16.msra.mxu0 %v1760_v22 }
  0x48   :  { %329 = vmatprep.subr.bf16.mxu0 %v1698_v2  ;;  %1259 = vmatpush3.bf16.msra.mxu1 %v1774_v26 }
  0x49   :  { %1264 = vmatprep.subr.bf16.mxu1 %v1637_v0 }
  0x4a   :  { %254 = vmatmul.mubr.bf16.vlgmr.msra.gmra.mrb[0].mxu0 %v1640_v25 }
  0x4b   :  { %330 = vmatpush1.bf16.msra.mxu0 %v1700_v3  ;;  %361 = vmatprep.mubr.bf16.mxu0 %v1638_v1 }
  0x4c   :  { %331 = vmatprep.subr.bf16.mxu0 %v1703_v4  ;;  %1261 = vmatmul.mubr.bf16.vlgmr.msra.gmra.mrb[0].mxu1 %v1640_v25 }
  0x4d   :  { %1265 = vmatpush3.bf16.msra.mxu1 %v1717_v9  ;;  %1280 = vmatprep.mubr.msk.bf16.mxu1 %vm1639_vm0, %v1637_v0 }
  0x4e   :  { %1266 = vmatprep.subr.bf16.mxu1 %v1637_v0 }
  0x4f   :  { %332 = vmatpush1.bf16.msra.mxu0 %v1706_v5 }
  0x50   :  { %333 = vmatprep.subr.bf16.mxu0 %v1709_v6 }
  0x51   :  { %1267 = vmatpush3.bf16.msra.mxu1 %v1727_v12 }
  0x52   :  { %1268 = vmatprep.subr.bf16.mxu1 %v1637_v0 }
  0x53   :  { %334 = vmatpush1.bf16.msra.mxu0 %v1712_v7 }
  0x54   :  { %335 = vmatprep.subr.bf16.mxu0 %v1715_v8 }
  0x55   :  { %1269 = vmatpush3.bf16.msra.mxu1 %v1733_v14 }
  0x56   :  { %1270 = vmatprep.subr.bf16.mxu1 %v1637_v0 }
  0x57   :  { %336 = vmatpush1.bf16.msra.mxu0 %v1720_v10 }
  0x58   :  { %337 = vmatprep.subr.bf16.mxu0 %v1724_v11 }
  0x59   :  { %1271 = vmatpush3.bf16.msra.mxu1 %v1743_v17 }
  0x5a   :  { %1272 = vmatprep.subr.bf16.mxu1 %v1637_v0 }
  0x5b   :  { %338 = vmatpush1.bf16.msra.mxu0 %v1729_v13 }
  0x5c   :  { %339 = vmatprep.subr.bf16.mxu0 %v1736_v15 }
  0x5d   :  { %1273 = vmatpush3.bf16.msra.mxu1 %v1753_v20 }
  0x5e   :  { %1274 = vmatprep.subr.bf16.mxu1 %v1637_v0 }
  0x5f   :  { %340 = vmatpush1.bf16.msra.mxu0 %v1740_v16 }
  0x60   :  { %341 = vmatprep.subr.bf16.mxu0 %v1746_v18 }
  0x61   :  { %1275 = vmatpush3.bf16.msra.mxu1 %v1763_v23 }
  0x62   :  { %1276 = vmatprep.subr.bf16.mxu1 %v1637_v0 }
  0x63   :  { %342 = vmatpush1.bf16.msra.mxu0 %v1750_v19 }
  0x64   :  { %343 = vmatprep.subr.bf16.mxu0 %v1756_v21 }
  0x65   :  { %1277 = vmatpush3.bf16.msra.mxu1 %v1769_v24 }
  0x66   :  { %1278 = vmatprep.subr.bf16.mxu1 %v1637_v0 }
  0x67   :  { %344 = vmatpush1.bf16.msra.mxu0 %v1760_v22 }
  0x68   :  { %439 = vmatprep.subr.bf16.mxu0 %v1698_v2 }
  0x69   :  { %1279 = vmatpush3.bf16.msra.mxu1 %v1774_v26 }
  0x6a   :  { %1284 = vmatprep.subr.bf16.mxu1 %v1637_v0 }
 0x11d   :  { %v255_v28 = vpop.f32.mrb[0].mxu0 }
 0x11e   :  { %v305_v29 = vadd.f32 %v302_v27, %v255_v28  ;;  %v257_v30 = vpop.f32.mrb[1].mxu0 }
 0x11f   :  { %v259_v32 = vpop.f32.mrb[2].mxu0  ;;  %v312_v35 = vadd.f32 %v303_v31, %v257_v30  ;;  %v296_v37 = vpop.f32.mrb[0].mxu1 }
 0x120   :  { %v1156_v33 = vmul.f32 -1.442695, %v305_v29  ;;  %v260_v34 = vpop.f32.mrb[3].mxu0  ;;  %v1262_v38 = vpop.f32.mrb[1].mxu1  ;;  %v319_v46 = vadd.f32 %v1817_v44, %v296_v37 }
 0x121   :  { %v1157_v36 = vmul.f32 -1.442695, %v312_v35  ;;  %v299_v39 = vpop.f32.mrb[2].mxu1 }
 0x122   :  { %1449 = vpow2.f32 %v1156_v33  ;;  %v1263_v40 = vpop.f32.mrb[3].mxu1 }
 0x123   :  { %1451 = vpow2.f32 %v1157_v36  ;;  %v413_v40 = vld [vmem:[#allocation2 + $0x28] sm:$0xff] }
 0x12c   :  { %v1450_v41 = vpop.eup %1449 }
 0x12d   :  { %v309_v42 = vadd.f32 1.0, %v1450_v41  ;;  %v1452_v43 = vpop.eup %1451 }
 0x12e   :  { %v316_v45 = vadd.f32 1.0, %v1452_v43 }
 0x12f   :  { %1453 = vrcp.f32 %v309_v42 }
 0x130   :  { %1455 = vrcp.f32 %v316_v45 }
 0x139   :  { %v1454_v47 = vpop.eup %1453 }
 0x13a   :  { %v320_v49 = vmul.f32 %v1454_v47, %v319_v46  ;;  %v1456_v51 = vpop.eup %1455 }
 0x13b   :  { %v323_v52 = vsub.f32 1.0, %v1456_v51  ;;  %v325_v55 = vmul.f32 0.0, %v1456_v51  ;;  %v521_v51 = vld [vmem:[#allocation2 + $0x30] sm:$0xff] }
 0x13c   :  { %v321_v50 = vadd.f32 %v320_v49, %v304_v48 }
 0x13e   :  { %1457 = vtanh.f32 %v321_v50 }
 0x148   :  { %v1458_v53 = vpop.eup %1457 }
 0x149   :  { %v324_v54 = vmul.f32 %v1458_v53, %v323_v52 }
 0x14b   :  { %v1820_v56 = vadd.f32 %v325_v55, %v324_v54 }
 0x14d   :  { %327 = vst [vmem:[#allocation7] sm:$0xff] %v1820_v56  ;;  %v328_v57 = vpack.c.bf16 %v1820_v56, %v1820_v56 }
 0x14f   :  { %362 = vmatmul.mubr.bf16.vlgmr.msra.gmra.mrb[4].mxu0 %v328_v57  ;;  %1281 = vmatmul.mubr.bf16.vlgmr.msra.gmra.mrb[4].mxu1 %v328_v57 }
 0x150   :  { %440 = vmatpush1.bf16.msra.mxu0 %v1700_v3  ;;  %1285 = vmatpush3.bf16.msra.mxu1 %v1717_v9 }
 0x151   :  { %441 = vmatprep.subr.bf16.mxu0 %v1703_v4  ;;  %1286 = vmatprep.subr.bf16.mxu1 %v1637_v0 }
 0x152   :  { %471 = vmatprep.mubr.bf16.mxu0 %v1638_v1  ;;  %1300 = vmatprep.mubr.msk.bf16.mxu1 %vm1639_vm0, %v1637_v0 }
 0x154   :  { %442 = vmatpush1.bf16.msra.mxu0 %v1706_v5  ;;  %1287 = vmatpush3.bf16.msra.mxu1 %v1727_v12 }
 0x155   :  { %443 = vmatprep.subr.bf16.mxu0 %v1709_v6  ;;  %1288 = vmatprep.subr.bf16.mxu1 %v1637_v0 }
 0x158   :  { %444 = vmatpush1.bf16.msra.mxu0 %v1712_v7  ;;  %1289 = vmatpush3.bf16.msra.mxu1 %v1733_v14 }
 0x159   :  { %445 = vmatprep.subr.bf16.mxu0 %v1715_v8  ;;  %1290 = vmatprep.subr.bf16.mxu1 %v1637_v0 }
 0x15c   :  { %446 = vmatpush1.bf16.msra.mxu0 %v1720_v10  ;;  %1291 = vmatpush3.bf16.msra.mxu1 %v1743_v17 }
 0x15d   :  { %447 = vmatprep.subr.bf16.mxu0 %v1724_v11  ;;  %1292 = vmatprep.subr.bf16.mxu1 %v1637_v0 }
 0x160   :  { %448 = vmatpush1.bf16.msra.mxu0 %v1729_v13  ;;  %1293 = vmatpush3.bf16.msra.mxu1 %v1753_v20 }
 0x161   :  { %449 = vmatprep.subr.bf16.mxu0 %v1736_v15  ;;  %1294 = vmatprep.subr.bf16.mxu1 %v1637_v0 }
 0x164   :  { %450 = vmatpush1.bf16.msra.mxu0 %v1740_v16  ;;  %1295 = vmatpush3.bf16.msra.mxu1 %v1763_v23 }
 0x165   :  { %451 = vmatprep.subr.bf16.mxu0 %v1746_v18  ;;  %1296 = vmatprep.subr.bf16.mxu1 %v1637_v0 }
 0x168   :  { %452 = vmatpush1.bf16.msra.mxu0 %v1750_v19  ;;  %1297 = vmatpush3.bf16.msra.mxu1 %v1769_v24 }
 0x169   :  { %453 = vmatprep.subr.bf16.mxu0 %v1756_v21  ;;  %1298 = vmatprep.subr.bf16.mxu1 %v1637_v0 }
 0x16c   :  { %454 = vmatpush1.bf16.msra.mxu0 %v1760_v22  ;;  %1299 = vmatpush3.bf16.msra.mxu1 %v1774_v26 }
 0x16d   :  { %549 = vmatprep.subr.bf16.mxu0 %v1698_v2  ;;  %1304 = vmatprep.subr.bf16.mxu1 %v1637_v0 }
 0x222   :  { %v363_v59 = vpop.f32.mrb[4].mxu0  ;;  %v404_v60 = vpop.f32.mrb[4].mxu1 }
 0x223   :  { %v414_v61 = vadd.f32 %v411_v58, %v363_v59  ;;  %v365_v62 = vpop.f32.mrb[5].mxu0  ;;  %v1282_v25 = vpop.f32.mrb[5].mxu1  ;;  %v428_v38 = vadd.f32 %v1817_v44, %v404_v60 }
 0x224   :  { %v367_v27 = vpop.f32.mrb[6].mxu0  ;;  %v407_v28 = vpop.f32.mrb[6].mxu1  ;;  %v421_v32 = vadd.f32 %v412_v63, %v365_v62 }
 0x225   :  { %v1158_v29 = vmul.f32 -1.442695, %v414_v61  ;;  %v368_v30 = vpop.f32.mrb[7].mxu0  ;;  %v1283_v31 = vpop.f32.mrb[7].mxu1 }
 0x226   :  { %v1159_v33 = vmul.f32 -1.442695, %v421_v32 }
 0x227   :  { %1459 = vpow2.f32 %v1158_v29 }
 0x228   :  { %1461 = vpow2.f32 %v1159_v33  ;;  %v523_v33 = vld [vmem:[#allocation2 + $0x40] sm:$0xff] }
 0x231   :  { %v1460_v34 = vpop.eup %1459 }
 0x232   :  { %v418_v35 = vadd.f32 1.0, %v1460_v34  ;;  %v1462_v36 = vpop.eup %1461 }
 0x233   :  { %v425_v37 = vadd.f32 1.0, %v1462_v36 }
 0x234   :  { %1463 = vrcp.f32 %v418_v35 }
 0x235   :  { %1465 = vrcp.f32 %v425_v37 }
 0x23e   :  { %v1464_v39 = vpop.eup %1463 }
 0x23f   :  { %v429_v41 = vmul.f32 %v1464_v39, %v428_v38  ;;  %v1466_v43 = vpop.eup %1465 }
 0x240   :  { %v432_v45 = vsub.f32 1.0, %v1466_v43  ;;  %v434_v48 = vmul.f32 %v1466_v43, %v1820_v56  ;;  %v522_v56 = vld [vmem:[#allocation2 + $0x38] sm:$0xff]  ;;  %v631_v43 = vld [vmem:[#allocation2 + $0x48] sm:$0xff] }
 0x241   :  { %v430_v42 = vadd.f32 %v429_v41, %v413_v40 }
 0x243   :  { %1467 = vtanh.f32 %v430_v42 }
 0x24d   :  { %v1468_v46 = vpop.eup %1467 }
 0x24e   :  { %v433_v47 = vmul.f32 %v1468_v46, %v432_v45 }
 0x250   :  { %v1862_v49 = vadd.f32 %v434_v48, %v433_v47 }
 0x252   :  { %437 = vst [vmem:[#allocation7 + $0x8] sm:$0xff] %v1862_v49  ;;  %v438_v50 = vpack.c.bf16 %v1862_v49, %v1862_v49 }
 0x254   :  { %472 = vmatmul.mubr.bf16.vlgmr.msra.gmra.mrb[8].mxu0 %v438_v50  ;;  %1301 = vmatmul.mubr.bf16.vlgmr.msra.gmra.mrb[8].mxu1 %v438_v50 }
 0x255   :  { %550 = vmatpush1.bf16.msra.mxu0 %v1700_v3  ;;  %1305 = vmatpush3.bf16.msra.mxu1 %v1717_v9 }
 0x256   :  { %551 = vmatprep.subr.bf16.mxu0 %v1703_v4  ;;  %1306 = vmatprep.subr.bf16.mxu1 %v1637_v0 }
 0x257   :  { %581 = vmatprep.mubr.bf16.mxu0 %v1638_v1  ;;  %1320 = vmatprep.mubr.msk.bf16.mxu1 %vm1639_vm0, %v1637_v0 }
 0x259   :  { %552 = vmatpush1.bf16.msra.mxu0 %v1706_v5  ;;  %1307 = vmatpush3.bf16.msra.mxu1 %v1727_v12 }
 0x25a   :  { %553 = vmatprep.subr.bf16.mxu0 %v1709_v6  ;;  %1308 = vmatprep.subr.bf16.mxu1 %v1637_v0 }
 0x25d   :  { %554 = vmatpush1.bf16.msra.mxu0 %v1712_v7  ;;  %1309 = vmatpush3.bf16.msra.mxu1 %v1733_v14 }
 0x25e   :  { %555 = vmatprep.subr.bf16.mxu0 %v1715_v8  ;;  %1310 = vmatprep.subr.bf16.mxu1 %v1637_v0 }
 0x261   :  { %556 = vmatpush1.bf16.msra.mxu0 %v1720_v10  ;;  %1311 = vmatpush3.bf16.msra.mxu1 %v1743_v17 }
 0x262   :  { %557 = vmatprep.subr.bf16.mxu0 %v1724_v11  ;;  %1312 = vmatprep.subr.bf16.mxu1 %v1637_v0 }
 0x265   :  { %558 = vmatpush1.bf16.msra.mxu0 %v1729_v13  ;;  %1313 = vmatpush3.bf16.msra.mxu1 %v1753_v20 }
 0x266   :  { %559 = vmatprep.subr.bf16.mxu0 %v1736_v15  ;;  %1314 = vmatprep.subr.bf16.mxu1 %v1637_v0 }
 0x269   :  { %560 = vmatpush1.bf16.msra.mxu0 %v1740_v16  ;;  %1315 = vmatpush3.bf16.msra.mxu1 %v1763_v23 }
 0x26a   :  { %561 = vmatprep.subr.bf16.mxu0 %v1746_v18  ;;  %1316 = vmatprep.subr.bf16.mxu1 %v1637_v0 }
 0x26d   :  { %562 = vmatpush1.bf16.msra.mxu0 %v1750_v19  ;;  %1317 = vmatpush3.bf16.msra.mxu1 %v1769_v24 }
 0x26e   :  { %563 = vmatprep.subr.bf16.mxu0 %v1756_v21  ;;  %1318 = vmatprep.subr.bf16.mxu1 %v1637_v0 }
 0x271   :  { %564 = vmatpush1.bf16.msra.mxu0 %v1760_v22  ;;  %1319 = vmatpush3.bf16.msra.mxu1 %v1774_v26 }
 0x272   :  { %659 = vmatprep.subr.bf16.mxu0 %v1698_v2  ;;  %1324 = vmatprep.subr.bf16.mxu1 %v1637_v0 }
 0x327   :  { %v473_v52 = vpop.f32.mrb[8].mxu0  ;;  %v514_v53 = vpop.f32.mrb[8].mxu1 }
 0x328   :  { %v524_v54 = vadd.f32 %v521_v51, %v473_v52  ;;  %v475_v55 = vpop.f32.mrb[9].mxu0  ;;  %v1302_v57 = vpop.f32.mrb[9].mxu1  ;;  %v538_v31 = vadd.f32 %v1817_v44, %v514_v53 }
 0x329   :  { %v477_v58 = vpop.f32.mrb[10].mxu0  ;;  %v517_v59 = vpop.f32.mrb[10].mxu1  ;;  %v531_v63 = vadd.f32 %v522_v56, %v475_v55 }
 0x32a   :  { %v1160_v60 = vmul.f32 -1.442695, %v524_v54  ;;  %v478_v61 = vpop.f32.mrb[11].mxu0  ;;  %v1303_v62 = vpop.f32.mrb[11].mxu1 }
 0x32b   :  { %v1161_v25 = vmul.f32 -1.442695, %v531_v63 }
 0x32c   :  { %1469 = vpow2.f32 %v1160_v60 }
 0x32d   :  { %1471 = vpow2.f32 %v1161_v25  ;;  %v633_v25 = vld [vmem:[#allocation2 + $0x58] sm:$0xff] }
 0x336   :  { %v1470_v27 = vpop.eup %1469 }
 0x337   :  { %v528_v28 = vadd.f32 1.0, %v1470_v27  ;;  %v1472_v29 = vpop.eup %1471 }
 0x338   :  { %v535_v30 = vadd.f32 1.0, %v1472_v29 }
 0x339   :  { %1473 = vrcp.f32 %v528_v28 }
 0x33a   :  { %1475 = vrcp.f32 %v535_v30 }
 0x343   :  { %v1474_v32 = vpop.eup %1473 }
 0x344   :  { %v539_v34 = vmul.f32 %v1474_v32, %v538_v31  ;;  %v1476_v36 = vpop.eup %1475 }
 0x345   :  { %v542_v37 = vsub.f32 1.0, %v1476_v36  ;;  %v544_v40 = vmul.f32 %v1476_v36, %v1862_v49  ;;  %v632_v49 = vld [vmem:[#allocation2 + $0x50] sm:$0xff]  ;;  %v741_v36 = vld [vmem:[#allocation2 + $0x60] sm:$0xff] }
 0x346   :  { %v540_v35 = vadd.f32 %v539_v34, %v523_v33 }
 0x348   :  { %1477 = vtanh.f32 %v540_v35 }
 0x352   :  { %v1478_v38 = vpop.eup %1477 }
 0x353   :  { %v543_v39 = vmul.f32 %v1478_v38, %v542_v37 }
 0x355   :  { %v1904_v41 = vadd.f32 %v544_v40, %v543_v39 }
 0x357   :  { %547 = vst [vmem:[#allocation7 + $0x10] sm:$0xff] %v1904_v41  ;;  %v548_v42 = vpack.c.bf16 %v1904_v41, %v1904_v41 }
 0x359   :  { %582 = vmatmul.mubr.bf16.vlgmr.msra.gmra.mrb[12].mxu0 %v548_v42  ;;  %1321 = vmatmul.mubr.bf16.vlgmr.msra.gmra.mrb[12].mxu1 %v548_v42 }
 0x35a   :  { %660 = vmatpush1.bf16.msra.mxu0 %v1700_v3  ;;  %1325 = vmatpush3.bf16.msra.mxu1 %v1717_v9 }
 0x35b   :  { %661 = vmatprep.subr.bf16.mxu0 %v1703_v4  ;;  %1326 = vmatprep.subr.bf16.mxu1 %v1637_v0 }
 0x35c   :  { %691 = vmatprep.mubr.bf16.mxu0 %v1638_v1  ;;  %1340 = vmatprep.mubr.msk.bf16.mxu1 %vm1639_vm0, %v1637_v0 }
 0x35e   :  { %662 = vmatpush1.bf16.msra.mxu0 %v1706_v5  ;;  %1327 = vmatpush3.bf16.msra.mxu1 %v1727_v12 }
 0x35f   :  { %663 = vmatprep.subr.bf16.mxu0 %v1709_v6  ;;  %1328 = vmatprep.subr.bf16.mxu1 %v1637_v0 }
 0x362   :  { %664 = vmatpush1.bf16.msra.mxu0 %v1712_v7  ;;  %1329 = vmatpush3.bf16.msra.mxu1 %v1733_v14 }
 0x363   :  { %665 = vmatprep.subr.bf16.mxu0 %v1715_v8  ;;  %1330 = vmatprep.subr.bf16.mxu1 %v1637_v0 }
 0x366   :  { %666 = vmatpush1.bf16.msra.mxu0 %v1720_v10  ;;  %1331 = vmatpush3.bf16.msra.mxu1 %v1743_v17 }
 0x367   :  { %667 = vmatprep.subr.bf16.mxu0 %v1724_v11  ;;  %1332 = vmatprep.subr.bf16.mxu1 %v1637_v0 }
 0x36a   :  { %668 = vmatpush1.bf16.msra.mxu0 %v1729_v13  ;;  %1333 = vmatpush3.bf16.msra.mxu1 %v1753_v20 }
 0x36b   :  { %669 = vmatprep.subr.bf16.mxu0 %v1736_v15  ;;  %1334 = vmatprep.subr.bf16.mxu1 %v1637_v0 }
 0x36e   :  { %670 = vmatpush1.bf16.msra.mxu0 %v1740_v16  ;;  %1335 = vmatpush3.bf16.msra.mxu1 %v1763_v23 }
 0x36f   :  { %671 = vmatprep.subr.bf16.mxu0 %v1746_v18  ;;  %1336 = vmatprep.subr.bf16.mxu1 %v1637_v0 }
 0x372   :  { %672 = vmatpush1.bf16.msra.mxu0 %v1750_v19  ;;  %1337 = vmatpush3.bf16.msra.mxu1 %v1769_v24 }
 0x373   :  { %673 = vmatprep.subr.bf16.mxu0 %v1756_v21  ;;  %1338 = vmatprep.subr.bf16.mxu1 %v1637_v0 }
 0x376   :  { %674 = vmatpush1.bf16.msra.mxu0 %v1760_v22  ;;  %1339 = vmatpush3.bf16.msra.mxu1 %v1774_v26 }
 0x377   :  { %769 = vmatprep.subr.bf16.mxu0 %v1698_v2  ;;  %1344 = vmatprep.subr.bf16.mxu1 %v1637_v0 }
 0x42c   :  { %v583_v45 = vpop.f32.mrb[12].mxu0  ;;  %v624_v46 = vpop.f32.mrb[12].mxu1 }
 0x42d   :  { %v634_v47 = vadd.f32 %v631_v43, %v583_v45  ;;  %v585_v48 = vpop.f32.mrb[13].mxu0  ;;  %v1322_v50 = vpop.f32.mrb[13].mxu1  ;;  %v648_v62 = vadd.f32 %v1817_v44, %v624_v46 }
 0x42e   :  { %v587_v51 = vpop.f32.mrb[14].mxu0  ;;  %v627_v52 = vpop.f32.mrb[14].mxu1  ;;  %v641_v56 = vadd.f32 %v632_v49, %v585_v48 }
 0x42f   :  { %v1162_v53 = vmul.f32 -1.442695, %v634_v47  ;;  %v588_v54 = vpop.f32.mrb[15].mxu0  ;;  %v1323_v55 = vpop.f32.mrb[15].mxu1 }
 0x430   :  { %v1163_v57 = vmul.f32 -1.442695, %v641_v56 }
 0x431   :  { %1479 = vpow2.f32 %v1162_v53 }
 0x432   :  { %1481 = vpow2.f32 %v1163_v57  ;;  %v743_v57 = vld [vmem:[#allocation2 + $0x70] sm:$0xff] }
 0x43b   :  { %v1480_v58 = vpop.eup %1479 }
 0x43c   :  { %v638_v59 = vadd.f32 1.0, %v1480_v58  ;;  %v1482_v60 = vpop.eup %1481 }
 0x43d   :  { %v645_v61 = vadd.f32 1.0, %v1482_v60 }
 0x43e   :  { %1483 = vrcp.f32 %v638_v59 }
 0x43f   :  { %1485 = vrcp.f32 %v645_v61 }
 0x448   :  { %v1484_v63 = vpop.eup %1483 }
 0x449   :  { %v649_v27 = vmul.f32 %v1484_v63, %v648_v62  ;;  %v1486_v29 = vpop.eup %1485 }
 0x44a   :  { %v652_v30 = vsub.f32 1.0, %v1486_v29  ;;  %v654_v33 = vmul.f32 %v1486_v29, %v1904_v41  ;;  %v742_v41 = vld [vmem:[#allocation2 + $0x68] sm:$0xff] }
 0x44b   :  { %v650_v28 = vadd.f32 %v649_v27, %v633_v25 }
 0x44d   :  { %1487 = vtanh.f32 %v650_v28 }
 0x457   :  { %v1488_v31 = vpop.eup %1487 }
 0x458   :  { %v653_v32 = vmul.f32 %v1488_v31, %v652_v30 }
 0x45a   :  { %v1946_v34 = vadd.f32 %v654_v33, %v653_v32 }
 0x45c   :  { %657 = vst [vmem:[#allocation7 + $0x18] sm:$0xff] %v1946_v34  ;;  %v658_v35 = vpack.c.bf16 %v1946_v34, %v1946_v34 }
 0x45e   :  { %692 = vmatmul.mubr.bf16.vlgmr.msra.gmra.mrb[16].mxu0 %v658_v35  ;;  %1341 = vmatmul.mubr.bf16.vlgmr.msra.gmra.mrb[16].mxu1 %v658_v35 }
 0x45f   :  { %770 = vmatpush1.bf16.msra.mxu0 %v1700_v3  ;;  %1345 = vmatpush3.bf16.msra.mxu1 %v1717_v9 }
 0x460   :  { %771 = vmatprep.subr.bf16.mxu0 %v1703_v4  ;;  %1346 = vmatprep.subr.bf16.mxu1 %v1637_v0 }
 0x461   :  { %801 = vmatprep.mubr.bf16.mxu0 %v1638_v1  ;;  %1360 = vmatprep.mubr.msk.bf16.mxu1 %vm1639_vm0, %v1637_v0 }
 0x463   :  { %772 = vmatpush1.bf16.msra.mxu0 %v1706_v5  ;;  %1347 = vmatpush3.bf16.msra.mxu1 %v1727_v12 }
 0x464   :  { %773 = vmatprep.subr.bf16.mxu0 %v1709_v6  ;;  %1348 = vmatprep.subr.bf16.mxu1 %v1637_v0 }
 0x467   :  { %774 = vmatpush1.bf16.msra.mxu0 %v1712_v7  ;;  %1349 = vmatpush3.bf16.msra.mxu1 %v1733_v14 }
 0x468   :  { %775 = vmatprep.subr.bf16.mxu0 %v1715_v8  ;;  %1350 = vmatprep.subr.bf16.mxu1 %v1637_v0 }
 0x46b   :  { %776 = vmatpush1.bf16.msra.mxu0 %v1720_v10  ;;  %1351 = vmatpush3.bf16.msra.mxu1 %v1743_v17 }
 0x46c   :  { %777 = vmatprep.subr.bf16.mxu0 %v1724_v11  ;;  %1352 = vmatprep.subr.bf16.mxu1 %v1637_v0 }
 0x46f   :  { %778 = vmatpush1.bf16.msra.mxu0 %v1729_v13  ;;  %1353 = vmatpush3.bf16.msra.mxu1 %v1753_v20 }
 0x470   :  { %779 = vmatprep.subr.bf16.mxu0 %v1736_v15  ;;  %1354 = vmatprep.subr.bf16.mxu1 %v1637_v0 }
 0x473   :  { %780 = vmatpush1.bf16.msra.mxu0 %v1740_v16  ;;  %1355 = vmatpush3.bf16.msra.mxu1 %v1763_v23 }
 0x474   :  { %781 = vmatprep.subr.bf16.mxu0 %v1746_v18  ;;  %1356 = vmatprep.subr.bf16.mxu1 %v1637_v0 }
 0x477   :  { %782 = vmatpush1.bf16.msra.mxu0 %v1750_v19  ;;  %1357 = vmatpush3.bf16.msra.mxu1 %v1769_v24 }
 0x478   :  { %783 = vmatprep.subr.bf16.mxu0 %v1756_v21  ;;  %1358 = vmatprep.subr.bf16.mxu1 %v1637_v0 }
 0x47b   :  { %784 = vmatpush1.bf16.msra.mxu0 %v1760_v22  ;;  %1359 = vmatpush3.bf16.msra.mxu1 %v1774_v26 }
 0x47c   :  { %879 = vmatprep.subr.bf16.mxu0 %v1698_v2  ;;  %1364 = vmatprep.subr.bf16.mxu1 %v1637_v0 }
 0x531   :  { %v693_v37 = vpop.f32.mrb[16].mxu0  ;;  %v734_v38 = vpop.f32.mrb[16].mxu1 }
 0x532   :  { %v744_v39 = vadd.f32 %v741_v36, %v693_v37  ;;  %v695_v40 = vpop.f32.mrb[17].mxu0  ;;  %v1342_v42 = vpop.f32.mrb[17].mxu1  ;;  %v758_v55 = vadd.f32 %v1817_v44, %v734_v38 }
 0x533   :  { %v697_v43 = vpop.f32.mrb[18].mxu0  ;;  %v737_v45 = vpop.f32.mrb[18].mxu1  ;;  %v751_v49 = vadd.f32 %v742_v41, %v695_v40  ;;  %v853_v42 = vld [vmem:[#allocation2 + $0x88] sm:$0xff] }
 0x534   :  { %v1164_v46 = vmul.f32 -1.442695, %v744_v39  ;;  %v698_v47 = vpop.f32.mrb[19].mxu0  ;;  %v1343_v48 = vpop.f32.mrb[19].mxu1 }
 0x535   :  { %v1165_v50 = vmul.f32 -1.442695, %v751_v49 }
 0x536   :  { %1489 = vpow2.f32 %v1164_v46 }
 0x537   :  { %1491 = vpow2.f32 %v1165_v50 }
 0x540   :  { %v1490_v51 = vpop.eup %1489 }
 0x541   :  { %v748_v52 = vadd.f32 1.0, %v1490_v51  ;;  %v1492_v53 = vpop.eup %1491 }
 0x542   :  { %v755_v54 = vadd.f32 1.0, %v1492_v53  ;;  %v1529_v53 = vld [vmem:[#allocation5] ss:$12 sps:$4 sm:$0xff]  }
 0x543   :  { %1493 = vrcp.f32 %v748_v52 }
 0x544   :  { %1495 = vrcp.f32 %v755_v54  ;;  %v1530_v54 = vld [vmem:[#allocation5 + $0x1c] ss:$12 sps:$4 sm:$0xff]  }
 0x54d   :  { %v1494_v56 = vpop.eup %1493 }
 0x54e   :  { %v759_v58 = vmul.f32 %v1494_v56, %v758_v55  ;;  %v1496_v60 = vpop.eup %1495  ;;  %v1531_v55 = vld [vmem:[#allocation5 + $0x18] ss:$12 sps:$4 sm:$0xff]   ;;  %v1532_v56 = vld [vmem:[#allocation5 + $0x34] ss:$12 sps:$4 sm:$0xff]  }
 0x54f   :  { %v762_v61 = vsub.f32 1.0, %v1496_v60  ;;  %v764_v25 = vmul.f32 %v1496_v60, %v1946_v34  ;;  %v963_v60 = vld [vmem:[#allocation2 + $0xa0] sm:$0xff] }
 0x550   :  { %v760_v59 = vadd.f32 %v759_v58, %v743_v57  ;;  %v1533_v57 = vld [vmem:[#allocation5 + $0x30] ss:$12 sps:$4 sm:$0xff]  }
 0x552   :  { %1497 = vtanh.f32 %v760_v59 }
 0x55c   :  { %v1498_v62 = vpop.eup %1497 }
 0x55d   :  { %v763_v63 = vmul.f32 %v1498_v62, %v762_v61 }
 0x55f   :  { %v1988_v27 = vadd.f32 %v764_v25, %v763_v63 }
 0x561   :  { %767 = vst [vmem:[#allocation7 + $0x20] sm:$0xff] %v1988_v27  ;;  %v768_v28 = vpack.c.bf16 %v1988_v27, %v1988_v27 }
 0x563   :  { %802 = vmatmul.mubr.bf16.vlgmr.msra.gmra.mrb[20].mxu0 %v768_v28  ;;  %1361 = vmatmul.mubr.bf16.vlgmr.msra.gmra.mrb[20].mxu1 %v768_v28 }
 0x564   :  { %880 = vmatpush1.bf16.msra.mxu0 %v1700_v3  ;;  %1365 = vmatpush3.bf16.msra.mxu1 %v1717_v9  ;;  %v851_v3 = vld [vmem:[#allocation2 + $0x78] sm:$0xff] }
 0x565   :  { %881 = vmatprep.subr.bf16.mxu0 %v1703_v4  ;;  %1366 = vmatprep.subr.bf16.mxu1 %v1637_v0 }
 0x566   :  { %911 = vmatprep.mubr.bf16.mxu0 %v1638_v1  ;;  %1380 = vmatprep.mubr.msk.bf16.mxu1 %vm1639_vm0, %v1637_v0 }
 0x568   :  { %882 = vmatpush1.bf16.msra.mxu0 %v1706_v5  ;;  %1367 = vmatpush3.bf16.msra.mxu1 %v1727_v12 }
 0x569   :  { %883 = vmatprep.subr.bf16.mxu0 %v1709_v6  ;;  %1368 = vmatprep.subr.bf16.mxu1 %v1637_v0 }
 0x56c   :  { %884 = vmatpush1.bf16.msra.mxu0 %v1712_v7  ;;  %1369 = vmatpush3.bf16.msra.mxu1 %v1733_v14 }
 0x56d   :  { %885 = vmatprep.subr.bf16.mxu0 %v1715_v8  ;;  %1370 = vmatprep.subr.bf16.mxu1 %v1637_v0  ;;  %v852_v8 = vld [vmem:[#allocation2 + $0x80] sm:$0xff] }
 0x570   :  { %886 = vmatpush1.bf16.msra.mxu0 %v1720_v10  ;;  %1371 = vmatpush3.bf16.msra.mxu1 %v1743_v17 }
 0x571   :  { %887 = vmatprep.subr.bf16.mxu0 %v1724_v11  ;;  %1372 = vmatprep.subr.bf16.mxu1 %v1637_v0 }
 0x574   :  { %888 = vmatpush1.bf16.msra.mxu0 %v1729_v13  ;;  %1373 = vmatpush3.bf16.msra.mxu1 %v1753_v20 }
 0x575   :  { %889 = vmatprep.subr.bf16.mxu0 %v1736_v15  ;;  %1374 = vmatprep.subr.bf16.mxu1 %v1637_v0 }
 0x578   :  { %890 = vmatpush1.bf16.msra.mxu0 %v1740_v16  ;;  %1375 = vmatpush3.bf16.msra.mxu1 %v1763_v23 }
 0x579   :  { %891 = vmatprep.subr.bf16.mxu0 %v1746_v18  ;;  %1376 = vmatprep.subr.bf16.mxu1 %v1637_v0 }
 0x57c   :  { %892 = vmatpush1.bf16.msra.mxu0 %v1750_v19  ;;  %1377 = vmatpush3.bf16.msra.mxu1 %v1769_v24 }
 0x57d   :  { %893 = vmatprep.subr.bf16.mxu0 %v1756_v21  ;;  %1378 = vmatprep.subr.bf16.mxu1 %v1637_v0 }
 0x580   :  { %894 = vmatpush1.bf16.msra.mxu0 %v1760_v22  ;;  %1379 = vmatpush3.bf16.msra.mxu1 %v1774_v26 }
 0x581   :  { %989 = vmatprep.subr.bf16.mxu0 %v1698_v2  ;;  %1384 = vmatprep.subr.bf16.mxu1 %v1637_v0 }
 0x636   :  { %v803_v4 = vpop.f32.mrb[20].mxu0  ;;  %v844_v5 = vpop.f32.mrb[20].mxu1 }
 0x637   :  { %v854_v6 = vadd.f32 %v851_v3, %v803_v4  ;;  %v805_v7 = vpop.f32.mrb[21].mxu0  ;;  %v1362_v29 = vpop.f32.mrb[21].mxu1  ;;  %v868_v40 = vadd.f32 %v1817_v44, %v844_v5 }
 0x638   :  { %v807_v30 = vpop.f32.mrb[22].mxu0  ;;  %v847_v31 = vpop.f32.mrb[22].mxu1  ;;  %v861_v35 = vadd.f32 %v852_v8, %v805_v7 }
 0x639   :  { %v1166_v32 = vmul.f32 -1.442695, %v854_v6  ;;  %v808_v33 = vpop.f32.mrb[23].mxu0  ;;  %v1363_v34 = vpop.f32.mrb[23].mxu1  ;;  %v1071_v6 = vld [vmem:[#allocation2 + $0xa8] sm:$0xff]  ;;  %v1072_v31 = vld [vmem:[#allocation2 + $0xb0] sm:$0xff] }
 0x63a   :  { %v1167_v36 = vmul.f32 -1.442695, %v861_v35 }
 0x63b   :  { %1499 = vpow2.f32 %v1166_v32 }
 0x63c   :  { %1501 = vpow2.f32 %v1167_v36 }
 0x645   :  { %v1500_v37 = vpop.eup %1499 }
 0x646   :  { %v858_v2 = vadd.f32 1.0, %v1500_v37  ;;  %v1502_v38 = vpop.eup %1501 }
 0x647   :  { %v865_v39 = vadd.f32 1.0, %v1502_v38 }
 0x648   :  { %1503 = vrcp.f32 %v858_v2 }
 0x649   :  { %1505 = vrcp.f32 %v865_v39 }
 0x652   :  { %v1504_v41 = vpop.eup %1503 }
 0x653   :  { %v869_v43 = vmul.f32 %v1504_v41, %v868_v40  ;;  %v1506_v46 = vpop.eup %1505 }
 0x654   :  { %v872_v47 = vsub.f32 1.0, %v1506_v46  ;;  %v874_v50 = vmul.f32 %v1506_v46, %v1988_v27  ;;  %v1073_v46 = vld [vmem:[#allocation2 + $0xb8] sm:$0xff] }
 0x655   :  { %v870_v45 = vadd.f32 %v869_v43, %v853_v42 }
 0x657   :  { %1507 = vtanh.f32 %v870_v45 }
 0x661   :  { %v1508_v48 = vpop.eup %1507 }
 0x662   :  { %v873_v49 = vmul.f32 %v1508_v48, %v872_v47 }
 0x664   :  { %v2030_v51 = vadd.f32 %v874_v50, %v873_v49 }
 0x666   :  { %877 = vst [vmem:[#allocation7 + $0x28] sm:$0xff] %v2030_v51  ;;  %v878_v52 = vpack.c.bf16 %v2030_v51, %v2030_v51 }
 0x668   :  { %912 = vmatmul.mubr.bf16.vlgmr.msra.gmra.mrb[24].mxu0 %v878_v52  ;;  %1381 = vmatmul.mubr.bf16.vlgmr.msra.gmra.mrb[24].mxu1 %v878_v52 }
 0x669   :  { %990 = vmatpush1.bf16.msra.mxu0 %v1529_v53  ;;  %1385 = vmatpush3.bf16.msra.mxu1 %v1717_v9  ;;  %v1534_v9 = vld [vmem:[#allocation5 + $0x4c] ss:$12 sps:$4 sm:$0xff]  }
 0x66a   :  { %991 = vmatprep.subr.bf16.mxu0 %v1530_v54  ;;  %1386 = vmatprep.subr.bf16.mxu1 %v1637_v0 }
 0x66b   :  { %1021 = vmatprep.mubr.bf16.mxu0 %v1638_v1  ;;  %1400 = vmatprep.mubr.msk.bf16.mxu1 %vm1639_vm0, %v1637_v0  ;;  %v961_v1 = vld [vmem:[#allocation2 + $0x90] sm:$0xff] }
 0x66d   :  { %992 = vmatpush1.bf16.msra.mxu0 %v1531_v55  ;;  %1387 = vmatpush3.bf16.msra.mxu1 %v1727_v12 }
 0x66e   :  { %993 = vmatprep.subr.bf16.mxu0 %v1532_v56  ;;  %1388 = vmatprep.subr.bf16.mxu1 %v1637_v0 }
 0x671   :  { %994 = vmatpush1.bf16.msra.mxu0 %v1533_v57  ;;  %1389 = vmatpush3.bf16.msra.mxu1 %v1733_v14  ;;  %v962_v14 = vld [vmem:[#allocation2 + $0x98] sm:$0xff] }
 0x672   :  { %995 = vmatprep.subr.bf16.mxu0 %v1534_v9  ;;  %1390 = vmatprep.subr.bf16.mxu1 %v1637_v0 }
 0x675   :  { %996 = vmatpush1.bf16.msra.mxu0 %v1720_v10  ;;  %1391 = vmatpush3.bf16.msra.mxu1 %v1743_v17 }
 0x676   :  { %997 = vmatprep.subr.bf16.mxu0 %v1724_v11  ;;  %1392 = vmatprep.subr.bf16.mxu1 %v1637_v0 }
 0x679   :  { %998 = vmatpush1.bf16.msra.mxu0 %v1729_v13  ;;  %1393 = vmatpush3.bf16.msra.mxu1 %v1753_v20 }
 0x67a   :  { %999 = vmatprep.subr.bf16.mxu0 %v1736_v15  ;;  %1394 = vmatprep.subr.bf16.mxu1 %v1637_v0 }
 0x67d   :  { %1000 = vmatpush1.bf16.msra.mxu0 %v1740_v16  ;;  %1395 = vmatpush3.bf16.msra.mxu1 %v1763_v23 }
 0x67e   :  { %1001 = vmatprep.subr.bf16.mxu0 %v1746_v18  ;;  %1396 = vmatprep.subr.bf16.mxu1 %v1637_v0 }
 0x681   :  { %1002 = vmatpush1.bf16.msra.mxu0 %v1750_v19  ;;  %1397 = vmatpush3.bf16.msra.mxu1 %v1769_v24 }
 0x682   :  { %1003 = vmatprep.subr.bf16.mxu0 %v1756_v21  ;;  %1398 = vmatprep.subr.bf16.mxu1 %v1637_v0 }
 0x685   :  { %1004 = vmatpush1.bf16.msra.mxu0 %v1760_v22  ;;  %1399 = vmatpush3.bf16.msra.mxu1 %v1774_v26 }
 0x73b   :  { %v913_v10 = vpop.f32.mrb[24].mxu0  ;;  %v954_v11 = vpop.f32.mrb[24].mxu1 }
 0x73c   :  { %v964_v12 = vadd.f32 %v961_v1, %v913_v10  ;;  %v915_v13 = vpop.f32.mrb[25].mxu0  ;;  %v1382_v15 = vpop.f32.mrb[25].mxu1  ;;  %v978_v58 = vadd.f32 %v1817_v44, %v954_v11 }
 0x73d   :  { %v917_v16 = vpop.f32.mrb[26].mxu0  ;;  %v957_v17 = vpop.f32.mrb[26].mxu1  ;;  %v971_v23 = vadd.f32 %v962_v14, %v915_v13 }
 0x73e   :  { %v1168_v18 = vmul.f32 -1.442695, %v964_v12  ;;  %v918_v19 = vpop.f32.mrb[27].mxu0  ;;  %v1383_v20 = vpop.f32.mrb[27].mxu1 }
 0x73f   :  { %v1169_v21 = vmul.f32 -1.442695, %v971_v23 }
 0x740   :  { %1509 = vpow2.f32 %v1168_v18 }
 0x741   :  { %1511 = vpow2.f32 %v1169_v21 }
 0x74a   :  { %v1510_v0 = vpop.eup %1509 }
 0x74b   :  { %v968_v22 = vadd.f32 1.0, %v1510_v0  ;;  %v1512_v24 = vpop.eup %1511 }
 0x74c   :  { %v975_v26 = vadd.f32 1.0, %v1512_v24 }
 0x74d   :  { %1513 = vrcp.f32 %v968_v22 }
 0x74e   :  { %1515 = vrcp.f32 %v975_v26 }
 0x757   :  { %v1514_v59 = vpop.eup %1513 }
 0x758   :  { %v979_v61 = vmul.f32 %v1514_v59, %v978_v58  ;;  %v1516_v63 = vpop.eup %1515 }
 0x759   :  { %v982_v25 = vsub.f32 1.0, %v1516_v63  ;;  %v984_v3 = vmul.f32 %v1516_v63, %v2030_v51 }
 0x75a   :  { %v980_v62 = vadd.f32 %v979_v61, %v963_v60 }
 0x75c   :  { %1517 = vtanh.f32 %v980_v62 }
 0x766   :  { %v1518_v27 = vpop.eup %1517 }
 0x767   :  { %v983_v28 = vmul.f32 %v1518_v27, %v982_v25 }
 0x769   :  { %v985_v4 = vadd.f32 %v984_v3, %v983_v28 }
 0x76b   :  { %987 = vst [vmem:[#allocation7 + $0x30] sm:$0xff] %v985_v4  ;;  %v988_v5 = vpack.c.bf16 %v985_v4, %v985_v4 }
 0x76d   :  { %1022 = vmatmul.mubr.bf16.vlgmr.msra.gmra.mrb[28].mxu0 %v988_v5  ;;  %1401 = vmatmul.mubr.bf16.vlgmr.msra.gmra.mrb[28].mxu1 %v988_v5 }
 0x840   :  { %v1023_v7 = vpop.f32.mrb[28].mxu0  ;;  %v1064_v8 = vpop.f32.mrb[28].mxu1 }
 0x841   :  { %v1074_v29 = vadd.f32 %v1071_v6, %v1023_v7  ;;  %v1025_v30 = vpop.f32.mrb[29].mxu0  ;;  %v1402_v32 = vpop.f32.mrb[29].mxu1  ;;  %v1088_v43 = vadd.f32 %v1817_v44, %v1064_v8 }
 0x842   :  { %v1027_v33 = vpop.f32.mrb[30].mxu0  ;;  %v1067_v34 = vpop.f32.mrb[30].mxu1  ;;  %v1081_v2 = vadd.f32 %v1072_v31, %v1025_v30 }
 0x843   :  { %v1170_v35 = vmul.f32 -1.442695, %v1074_v29  ;;  %v1028_v36 = vpop.f32.mrb[31].mxu0  ;;  %v1403_v37 = vpop.f32.mrb[31].mxu1 }
 0x844   :  { %v1171_v38 = vmul.f32 -1.442695, %v1081_v2 }
 0x845   :  { %1519 = vpow2.f32 %v1170_v35 }
 0x846   :  { %1521 = vpow2.f32 %v1171_v38 }
 0x84f   :  { %v1520_v39 = vpop.eup %1519 }
 0x850   :  { %v1078_v40 = vadd.f32 1.0, %v1520_v39  ;;  %v1522_v41 = vpop.eup %1521 }
 0x851   :  { %v1085_v42 = vadd.f32 1.0, %v1522_v41 }
 0x852   :  { %1523 = vrcp.f32 %v1078_v40 }
 0x853   :  { %1525 = vrcp.f32 %v1085_v42 }
 0x85c   :  { %v1524_v45 = vpop.eup %1523 }
 0x85d   :  { %v1089_v47 = vmul.f32 %v1524_v45, %v1088_v43  ;;  %v1526_v49 = vpop.eup %1525 }
 0x85e   :  { %v1092_v50 = vsub.f32 1.0, %v1526_v49  ;;  %v1094_v53 = vmul.f32 %v1526_v49, %v985_v4 }
 0x85f   :  { %v1090_v48 = vadd.f32 %v1089_v47, %v1073_v46 }
 0x861   :  { %1527 = vtanh.f32 %v1090_v48 }
 0x86b   :  { %v1528_v51 = vpop.eup %1527 }
 0x86c   :  { %v1093_v52 = vmul.f32 %v1528_v51, %v1092_v50 }
 0x86e   :  { %v1095_v54 = vadd.f32 %v1094_v53, %v1093_v52 }
 0x870   :  { %1097 = vst [vmem:[#allocation7 + $0x38] sm:$0xff] %v1095_v54  ;;  %1098 = vst [vmem:[#allocation8] sm:$0xff] %v1095_v54 }
 0x871   :  { %1590 = shalt.err (!%p1587_p6)
}
 0x872   :  { %s1591_s23 = scalar_lea.hbm %s2099_s3, 1024 }
 0x873   :  { %p1592_p7 = scmp.ne.s32.totalorder %s2099_s3, %s1591_s23  ;;  %p1595_p8 = scmp.lt.u32.totalorder %s1591_s23, %s2099_s3 }
 0x875   :  { %p1597_p9 = pnand %p1595_p8, %p1592_p7 }
 0x877   :  { %1600 = shalt.err (!%p1597_p9)
}
 0x878   :  { %s1643_s28 = smov 128   ;;  %s1644_s29 = smov 8  }
 0x879   :  { %1110 = dma.vmem_to_hbm [thread:$0]  %s1105_s17, 1024, %s2099_s3, [#allocation4], %s1643_s28, %s1643_s28, %s1644_s29  }
 0x87a   :  { %s1601_s6 = scalar_lea.vmem %s2065_s19, 128  ;;  %p1606_p11 = scmp.lt.s32.totalorder %s2065_s19, %s2065_s19 }
 0x87b   :  { %p1602_p10 = scmp.ne.s32.totalorder %s2065_s19, %s1601_s6  ;;  %p1607_p12 = scmp.lt.s32.totalorder %s1601_s6, %s1601_s6 }
 0x87d   :  { %p1608_p13 = por %p1607_p12, %p1606_p11 }
 0x87f   :  { %p1609_p0 = pnand %p1608_p13, %p1602_p10 }
 0x881   :  { %1612 = shalt.err (!%p1609_p0)
}
 0x882   :  { %s1613_s9 = scalar_lea.hbm %s2100_s4, 128 }
 0x883   :  { %p1614_p1 = scmp.ne.s32.totalorder %s2100_s4, %s1613_s9  ;;  %p1617_p2 = scmp.lt.u32.totalorder %s1613_s9, %s2100_s4 }
 0x885   :  { %p1619_p3 = pnand %p1617_p2, %p1614_p1 }
 0x887   :  { %1622 = shalt.err (!%p1619_p3)
}
 0x888   :  { %1120 = dma.vmem_to_hbm [thread:$0]  %s2065_s19, 128, %s2100_s4, [#allocation9]  }
 0x889   :  { %1627 = dma.done.wait [#allocation4], 1024  }
 0x88a   :  { %1628 = vsyncadd [#allocation4], 4294966272 }
 0x88b   :  { %1629 = dma.done.wait [#allocation9], 128  }
 0x88c   :  { %1630 = vsyncadd [#allocation9], 4294967168 }
 0x88d   :  { %1127 = vsyncpa [#allocation3], 1 }
 0x88e   :  { %1128 = vsyncpa [#allocation6], 1 }
 0x88f   :  { %1129 = vsyncpa [#allocation4], 1 }
 0x890   :  { %1130 = vsyncpa [#allocation9], 1 }

</bundles_post_ra>
